<compile_context>
chip_gen: v7x
topology: tpu7x:2x2x1
jax: 0.10.0
libtpu: 0.0.40
codegen_flags: <defaults>
</compile_context>

<pallas_src>
import functools
import math

import jax
import jax.numpy as jnp
import numpy as np
from jax import lax
from jax.experimental import pallas as pl
from jax.experimental.pallas import tpu as pltpu


def _round_up(n, m):
    return ((n + m - 1) // m) * m


# ----------------------------------------------------------------------------- #
# Fused encoder kernel: one batch element per grid step
# ----------------------------------------------------------------------------- #
def _encoder_fused_kernel(x_ref, w1_ref, b1_ref, w2_ref, b2_ref, m_ref,
                          wfc_ref, bfc_ref, o_ref, *, H, W):
    """Whole encoder for ONE image.

    x_ref  : (Cin_p, HW)        input feature map, flattened spatial
    w1_ref : (C1_p, 9*Cin_p)    conv1 weights, taps stacked along K
    b1_ref : (C1_p, 1)          conv1 bias
    w2_ref : (C2_p, 9*C1_p)     conv2 weights
    b2_ref : (C2_p, 1)          conv2 bias
    m_ref  : (9, 1, HW)         per-tap validity masks (1 inside image, 0 = padding)
    wfc_ref: (C2_p, 2Z, HW)     fused fc31/fc32 weights, lane-dense (HW on lanes)
    bfc_ref: (1, 2Z)            fused fc bias
    o_ref  : (1, 2Z)            output [mu | log_var]
    """
    HW = H * W

    def conv3x3_relu(x, w, b):
        taps = []
        for dy in range(3):
            for dx in range(3):
                k = dy * 3 + dx
                s = (dy - 1) * W + (dx - 1)            # flat spatial offset of tap
                if (s % HW) != 0:
                    # want patch[p] = x[p + s]  ->  roll by -s (jnp.roll convention)
                    shifted = pltpu.roll(x, shift=(-s) % HW, axis=1)
                else:
                    shifted = x
                taps.append(shifted * m_ref[k])        # zero out padded taps
        patches = jnp.concatenate(taps, axis=0)        # (9*Cin_p, HW)
        y = jnp.dot(w, patches, preferred_element_type=jnp.float32) + b
        return jnp.maximum(y, 0.0)

    h1 = conv3x3_relu(x_ref[...], w1_ref[...], b1_ref[...])   # (C1_p, HW)
    h2 = conv3x3_relu(h1, w2_ref[...], b2_ref[...])           # (C2_p, HW)

    # Fused FC heads: out[z] = sum_{c,s} Wfc[c, z, s] * h2[c, s] + b[z]
    C2_p = wfc_ref.shape[0]
    acc = bfc_ref[...].astype(jnp.float32)                    # (1, 2Z)
    for c in range(C2_p):
        acc = acc + lax.dot_general(
            h2[c:c + 1, :], wfc_ref[c],                       # (1,HW) x (2Z,HW)
            dimension_numbers=(((1,), (1,)), ((), ())),
            preferred_element_type=jnp.float32)
    o_ref[...] = acc.astype(o_ref.dtype)


def encoder_forward(x_flat_padded, params, H, W, z_dim):
    """x_flat_padded: (N, Cin_p, H*W) -> (mu, log_var) each (N, z_dim)."""
    (w1s, b1c, w2s, b2c, masks, wfc_r, bfc_r) = params
    N, Cin_p, HW = x_flat_padded.shape
    C1_p = w1s.shape[0]
    C2_p = w2s.shape[0]
    Z2 = 2 * z_dim

    kernel = functools.partial(_encoder_fused_kernel, H=H, W=W)
    out = pl.pallas_call(
        kernel,
        out_shape=jax.ShapeDtypeStruct((N, 1, Z2), jnp.float32),
        grid=(N,),
        in_specs=[
            pl.BlockSpec((None, Cin_p, HW), lambda n: (n, 0, 0)),
            pl.BlockSpec((C1_p, 9 * Cin_p), lambda n: (0, 0)),
            pl.BlockSpec((C1_p, 1), lambda n: (0, 0)),
            pl.BlockSpec((C2_p, 9 * C1_p), lambda n: (0, 0)),
            pl.BlockSpec((C2_p, 1), lambda n: (0, 0)),
            pl.BlockSpec((9, 1, HW), lambda n: (0, 0, 0)),
            pl.BlockSpec((C2_p, Z2, HW), lambda n: (0, 0, 0)),
            pl.BlockSpec((1, Z2), lambda n: (0, 0)),
        ],
        out_specs=pl.BlockSpec((None, 1, Z2), lambda n: (n, 0, 0)),
        compiler_params=pltpu.CompilerParams(
            dimension_semantics=("parallel",)),
    )(x_flat_padded, w1s, b1c, w2s, b2c, masks, wfc_r, bfc_r)

    out = out.reshape(N, Z2)
    return out[:, :z_dim], out[:, z_dim:]


# ----------------------------------------------------------------------------- #
# Parameter setup / glue
# ----------------------------------------------------------------------------- #
def make_tap_masks(H, W):
    """(9, 1, H*W) float32 masks: 1.0 where the (dy,dx) tap lands inside the image."""
    hh, ww = np.meshgrid(np.arange(H), np.arange(W), indexing="ij")
    m = np.zeros((9, H, W), np.float32)
    for dy in range(3):
        for dx in range(3):
            valid = ((hh + dy - 1 >= 0) & (hh + dy - 1 < H)
                     & (ww + dx - 1 >= 0) & (ww + dx - 1 < W))
            m[dy * 3 + dx] = valid.astype(np.float32)
    return m.reshape(9, 1, H * W)


def _stack_conv_weight(w, cout_p, cin_p):
    """(Cout, Cin, 3, 3) OIHW -> (Cout_p, 9*Cin_p), column index = (dy*3+dx)*Cin_p + cin."""
    Cout, Cin = w.shape[:2]
    wp = jnp.zeros((cout_p, cin_p, 3, 3), w.dtype).at[:Cout, :Cin].set(w)
    return jnp.transpose(wp, (0, 2, 3, 1)).reshape(cout_p, 9 * cin_p)


def _pad_bias_col(b, cout_p):
    return jnp.zeros((cout_p, 1), b.dtype).at[:b.shape[0], 0].set(b)


def _uniform(key, shape, bound):
    return jax.random.uniform(key, shape, jnp.float32, -bound, bound)


class EncoderPallas:
    """JAX/Pallas port of the PyTorch Encoder (deterministic synthetic params)."""

    def __init__(self, input_shape, x_dim, h_dim1, h_dim2, z_dim, key):
        H, W = input_shape
        HW = H * W
        self.input_shape = input_shape
        self.x_dim = x_dim
        self.z_dim = z_dim
        ks = jax.random.split(key, 8)

        # PyTorch-default init bounds
        bc1 = 1.0 / math.sqrt(x_dim * 9)
        self.conv1_w = _uniform(ks[0], (h_dim1, x_dim, 3, 3), bc1)
        self.conv1_b = _uniform(ks[1], (h_dim1,), bc1)
        bc2 = 1.0 / math.sqrt(h_dim1 * 9)
        self.conv2_w = _uniform(ks[2], (h_dim2, h_dim1, 3, 3), bc2)
        self.conv2_b = _uniform(ks[3], (h_dim2,), bc2)

        feat = h_dim2 * HW   # padding=1, k=3 -> spatial shape preserved
        bl = 1.0 / math.sqrt(feat)
        self.fc31_w = _uniform(ks[4], (z_dim, feat), bl)
        self.fc31_b = _uniform(ks[5], (z_dim,), bl)
        self.fc32_w = _uniform(ks[6], (z_dim, feat), bl)
        self.fc32_b = _uniform(ks[7], (z_dim,), bl)

        # --- kernel-friendly layouts (glue, channel counts padded to mult of 8) ---
        self.cin_p = _round_up(x_dim, 8)
        c1_p = _round_up(h_dim1, 8)
        c2_p = _round_up(h_dim2, 8)

        w1s = _stack_conv_weight(self.conv1_w, c1_p, self.cin_p)   # (C1_p, 9*Cin_p)
        b1c = _pad_bias_col(self.conv1_b, c1_p)
        w2s = _stack_conv_weight(self.conv2_w, c2_p, c1_p)         # (C2_p, 9*C1_p)
        b2c = _pad_bias_col(self.conv2_b, c2_p)

        # fused, lane-dense FC weights: (C2_p, 2Z, HW); bias: (1, 2Z)
        wfc = jnp.concatenate([self.fc31_w, self.fc32_w], axis=0)  # (2Z, C2*HW)
        wfc3 = wfc.reshape(2 * z_dim, h_dim2, HW)                  # (2Z, C2, HW)
        wfc_r = jnp.zeros((c2_p, 2 * z_dim, HW), jnp.float32)
        wfc_r = wfc_r.at[:h_dim2].set(jnp.transpose(wfc3, (1, 0, 2)))
        bfc_r = jnp.concatenate([self.fc31_b, self.fc32_b]).reshape(1, 2 * z_dim)

        masks = jnp.asarray(make_tap_masks(H, W))
        self.params = (w1s, b1c, w2s, b2c, masks, wfc_r, bfc_r)

    def __call__(self, x):
        # x: (N, x_dim, H, W)  (NCHW, like PyTorch)
        H, W = self.input_shape
        N = x.shape[0]
        x_flat = x.reshape(N, self.x_dim, H * W)
        if self.cin_p > self.x_dim:
            x_flat = jnp.pad(
                x_flat, ((0, 0), (0, self.cin_p - self.x_dim), (0, 0)))
        return encoder_forward(x_flat, self.params, H, W, self.z_dim)

    # pure-JAX reference (XLA conv) for correctness checking
    def reference(self, x):
        def conv(h, w, b):
            y = lax.conv_general_dilated(
                h, w, window_strides=(1, 1), padding=((1, 1), (1, 1)),
                dimension_numbers=("NCHW", "OIHW", "NCHW"))
            return jax.nn.relu(y + b[None, :, None, None])

        h = conv(x, self.conv1_w, self.conv1_b)
        h = conv(h, self.conv2_w, self.conv2_b)
        hf = h.reshape(x.shape[0], -1)
        mu = hf @ self.fc31_w.T + self.fc31_b
        lv = hf @ self.fc32_w.T + self.fc32_b
        return mu, lv


if __name__ == "__main__":
    key = jax.random.PRNGKey(0)
    input_shape = (16, 16)
    x_dim, h_dim1, h_dim2, z_dim = 4, 8, 16, 8
    batch = 2

    enc = EncoderPallas(input_shape, x_dim, h_dim1, h_dim2, z_dim, key)
    x = jax.random.normal(jax.random.fold_in(key, 123),
                          (batch, x_dim, *input_shape), jnp.float32)

    mu, log_var = enc(x)
    jax.block_until_ready((mu, log_var))

    mu_ref, lv_ref = enc.reference(x)
    np.testing.assert_allclose(np.asarray(mu), np.asarray(mu_ref), rtol=1e-3, atol=1e-3)
    np.testing.assert_allclose(np.asarray(log_var), np.asarray(lv_ref), rtol=1e-3, atol=1e-3)

    print("KERNEL_OK")
</pallas_src>

<mosaic_0001>
module attributes {stable_mosaic.version = 11 : i64} {
  func.func @_encoder_fused_kernel(%arg0: i32, %arg1: memref<1x8x256xf32, #tpu.memory_space<vmem>>, %arg2: memref<8x72xf32, #tpu.memory_space<vmem>>, %arg3: memref<8x1xf32, #tpu.memory_space<vmem>>, %arg4: memref<16x72xf32, #tpu.memory_space<vmem>>, %arg5: memref<16x1xf32, #tpu.memory_space<vmem>>, %arg6: memref<9x1x256xf32, #tpu.memory_space<vmem>>, %arg7: memref<16x16x256xf32, #tpu.memory_space<vmem>>, %arg8: memref<1x16xf32, #tpu.memory_space<vmem>>, %arg9: memref<1x1x16xf32, #tpu.memory_space<vmem>>) attributes {dimension_semantics = [#tpu.dimension_semantics<parallel>], iteration_bounds = array<i64: 2>, scalar_prefetch = 0 : i64, scratch_operands = 0 : i64, tpu.core_type = #tpu.core_type<tc>, window_params = [{transform_indices = @transform_0, window_bounds = array<i64: 1, 8, 256>}, {pipeline_mode = #tpu.pipeline_mode<synchronous>, transform_indices = @transform_1, window_bounds = array<i64: 8, 72>}, {pipeline_mode = #tpu.pipeline_mode<synchronous>, transform_indices = @transform_2, window_bounds = array<i64: 8, 1>}, {pipeline_mode = #tpu.pipeline_mode<synchronous>, transform_indices = @transform_3, window_bounds = array<i64: 16, 72>}, {pipeline_mode = #tpu.pipeline_mode<synchronous>, transform_indices = @transform_4, window_bounds = array<i64: 16, 1>}, {pipeline_mode = #tpu.pipeline_mode<synchronous>, transform_indices = @transform_5, window_bounds = array<i64: 9, 1, 256>}, {pipeline_mode = #tpu.pipeline_mode<synchronous>, transform_indices = @transform_6, window_bounds = array<i64: 16, 16, 256>}, {pipeline_mode = #tpu.pipeline_mode<synchronous>, transform_indices = @transform_7, window_bounds = array<i64: 1, 16>}, {transform_indices = @transform_8, window_bounds = array<i64: 1, 1, 16>}]} {
    %c0 = arith.constant 0 : index
    %c0_0 = arith.constant 0 : index
    %c0_1 = arith.constant 0 : index
    %0 = vector.load %arg1[%c0, %c0_0, %c0_1] : memref<1x8x256xf32, #tpu.memory_space<vmem>>, vector<1x8x256xf32>
    %1 = vector.shape_cast %0 : vector<1x8x256xf32> to vector<8x256xf32>
    %c0_2 = arith.constant 0 : index
    %c0_3 = arith.constant 0 : index
    %2 = vector.load %arg2[%c0_2, %c0_3] : memref<8x72xf32, #tpu.memory_space<vmem>>, vector<8x72xf32>
    %c0_4 = arith.constant 0 : index
    %c0_5 = arith.constant 0 : index
    %3 = vector.load %arg3[%c0_4, %c0_5] : memref<8x1xf32, #tpu.memory_space<vmem>>, vector<8x1xf32>
    %c17_i32 = arith.constant 17 : i32
    %4 = tpu.dynamic_rotate %1 by %c17_i32 dim 1 : vector<8x256xf32>, i32 -> vector<8x256xf32>
    %c0_6 = arith.constant 0 : index
    %c0_7 = arith.constant 0 : index
    %c0_8 = arith.constant 0 : index
    %5 = vector.load %arg6[%c0_6, %c0_7, %c0_8] : memref<9x1x256xf32, #tpu.memory_space<vmem>>, vector<1x1x256xf32>
    %6 = vector.shape_cast %5 : vector<1x1x256xf32> to vector<1x256xf32>
    %7 = vector.broadcast %6 : vector<1x256xf32> to vector<8x256xf32>
    %8 = arith.mulf %4, %7 : vector<8x256xf32>
    %c16_i32 = arith.constant 16 : i32
    %9 = tpu.dynamic_rotate %1 by %c16_i32 dim 1 : vector<8x256xf32>, i32 -> vector<8x256xf32>
    %c1 = arith.constant 1 : index
    %c0_9 = arith.constant 0 : index
    %c0_10 = arith.constant 0 : index
    %10 = vector.load %arg6[%c1, %c0_9, %c0_10] : memref<9x1x256xf32, #tpu.memory_space<vmem>>, vector<1x1x256xf32>
    %11 = vector.shape_cast %10 : vector<1x1x256xf32> to vector<1x256xf32>
    %12 = vector.broadcast %11 : vector<1x256xf32> to vector<8x256xf32>
    %13 = arith.mulf %9, %12 : vector<8x256xf32>
    %c15_i32 = arith.constant 15 : i32
    %14 = tpu.dynamic_rotate %1 by %c15_i32 dim 1 : vector<8x256xf32>, i32 -> vector<8x256xf32>
    %c2 = arith.constant 2 : index
    %c0_11 = arith.constant 0 : index
    %c0_12 = arith.constant 0 : index
    %15 = vector.load %arg6[%c2, %c0_11, %c0_12] : memref<9x1x256xf32, #tpu.memory_space<vmem>>, vector<1x1x256xf32>
    %16 = vector.shape_cast %15 : vector<1x1x256xf32> to vector<1x256xf32>
    %17 = vector.broadcast %16 : vector<1x256xf32> to vector<8x256xf32>
    %18 = arith.mulf %14, %17 : vector<8x256xf32>
    %c1_i32 = arith.constant 1 : i32
    %19 = tpu.dynamic_rotate %1 by %c1_i32 dim 1 : vector<8x256xf32>, i32 -> vector<8x256xf32>
    %c3 = arith.constant 3 : index
    %c0_13 = arith.constant 0 : index
    %c0_14 = arith.constant 0 : index
    %20 = vector.load %arg6[%c3, %c0_13, %c0_14] : memref<9x1x256xf32, #tpu.memory_space<vmem>>, vector<1x1x256xf32>
    %21 = vector.shape_cast %20 : vector<1x1x256xf32> to vector<1x256xf32>
    %22 = vector.broadcast %21 : vector<1x256xf32> to vector<8x256xf32>
    %23 = arith.mulf %19, %22 : vector<8x256xf32>
    %c4 = arith.constant 4 : index
    %c0_15 = arith.constant 0 : index
    %c0_16 = arith.constant 0 : index
    %24 = vector.load %arg6[%c4, %c0_15, %c0_16] : memref<9x1x256xf32, #tpu.memory_space<vmem>>, vector<1x1x256xf32>
    %25 = vector.shape_cast %24 : vector<1x1x256xf32> to vector<1x256xf32>
    %26 = vector.broadcast %25 : vector<1x256xf32> to vector<8x256xf32>
    %27 = arith.mulf %1, %26 : vector<8x256xf32>
    %c255_i32 = arith.constant 255 : i32
    %28 = tpu.dynamic_rotate %1 by %c255_i32 dim 1 : vector<8x256xf32>, i32 -> vector<8x256xf32>
    %c5 = arith.constant 5 : index
    %c0_17 = arith.constant 0 : index
    %c0_18 = arith.constant 0 : index
    %29 = vector.load %arg6[%c5, %c0_17, %c0_18] : memref<9x1x256xf32, #tpu.memory_space<vmem>>, vector<1x1x256xf32>
    %30 = vector.shape_cast %29 : vector<1x1x256xf32> to vector<1x256xf32>
    %31 = vector.broadcast %30 : vector<1x256xf32> to vector<8x256xf32>
    %32 = arith.mulf %28, %31 : vector<8x256xf32>
    %c241_i32 = arith.constant 241 : i32
    %33 = tpu.dynamic_rotate %1 by %c241_i32 dim 1 : vector<8x256xf32>, i32 -> vector<8x256xf32>
    %c6 = arith.constant 6 : index
    %c0_19 = arith.constant 0 : index
    %c0_20 = arith.constant 0 : index
    %34 = vector.load %arg6[%c6, %c0_19, %c0_20] : memref<9x1x256xf32, #tpu.memory_space<vmem>>, vector<1x1x256xf32>
    %35 = vector.shape_cast %34 : vector<1x1x256xf32> to vector<1x256xf32>
    %36 = vector.broadcast %35 : vector<1x256xf32> to vector<8x256xf32>
    %37 = arith.mulf %33, %36 : vector<8x256xf32>
    %c240_i32 = arith.constant 240 : i32
    %38 = tpu.dynamic_rotate %1 by %c240_i32 dim 1 : vector<8x256xf32>, i32 -> vector<8x256xf32>
    %c7 = arith.constant 7 : index
    %c0_21 = arith.constant 0 : index
    %c0_22 = arith.constant 0 : index
    %39 = vector.load %arg6[%c7, %c0_21, %c0_22] : memref<9x1x256xf32, #tpu.memory_space<vmem>>, vector<1x1x256xf32>
    %40 = vector.shape_cast %39 : vector<1x1x256xf32> to vector<1x256xf32>
    %41 = vector.broadcast %40 : vector<1x256xf32> to vector<8x256xf32>
    %42 = arith.mulf %38, %41 : vector<8x256xf32>
    %c239_i32 = arith.constant 239 : i32
    %43 = tpu.dynamic_rotate %1 by %c239_i32 dim 1 : vector<8x256xf32>, i32 -> vector<8x256xf32>
    %c8 = arith.constant 8 : index
    %c0_23 = arith.constant 0 : index
    %c0_24 = arith.constant 0 : index
    %44 = vector.load %arg6[%c8, %c0_23, %c0_24] : memref<9x1x256xf32, #tpu.memory_space<vmem>>, vector<1x1x256xf32>
    %45 = vector.shape_cast %44 : vector<1x1x256xf32> to vector<1x256xf32>
    %46 = vector.broadcast %45 : vector<1x256xf32> to vector<8x256xf32>
    %47 = arith.mulf %43, %46 : vector<8x256xf32>
    %48 = tpu.concatenate %8, %13, %18, %23, %27, %32, %37, %42, %47 in 0 : vector<8x256xf32>, vector<8x256xf32>, vector<8x256xf32>, vector<8x256xf32>, vector<8x256xf32>, vector<8x256xf32>, vector<8x256xf32>, vector<8x256xf32>, vector<8x256xf32> -> vector<72x256xf32>
    %cst = arith.constant dense<0.000000e+00> : vector<8x256xf32>
    %49 = tpu.matmul %2, %48, %cst {dimension_numbers = #tpu.dot_dimension_numbers<[1], [0], [0], [1], [0, 0, 1, 1], [], []>} : vector<8x72xf32>, vector<72x256xf32>, vector<8x256xf32> -> vector<8x256xf32>
    %50 = vector.broadcast %3 : vector<8x1xf32> to vector<8x256xf32>
    %51 = arith.addf %49, %50 : vector<8x256xf32>
    %cst_25 = arith.constant 0.000000e+00 : f32
    %52 = vector.broadcast %cst_25 : f32 to vector<8x256xf32>
    %53 = arith.maximumf %51, %52 : vector<8x256xf32>
    %c0_26 = arith.constant 0 : index
    %c0_27 = arith.constant 0 : index
    %54 = vector.load %arg4[%c0_26, %c0_27] : memref<16x72xf32, #tpu.memory_space<vmem>>, vector<16x72xf32>
    %c0_28 = arith.constant 0 : index
    %c0_29 = arith.constant 0 : index
    %55 = vector.load %arg5[%c0_28, %c0_29] : memref<16x1xf32, #tpu.memory_space<vmem>>, vector<16x1xf32>
    %c17_i32_30 = arith.constant 17 : i32
    %56 = tpu.dynamic_rotate %53 by %c17_i32_30 dim 1 : vector<8x256xf32>, i32 -> vector<8x256xf32>
    %c0_31 = arith.constant 0 : index
    %c0_32 = arith.constant 0 : index
    %c0_33 = arith.constant 0 : index
    %57 = vector.load %arg6[%c0_31, %c0_32, %c0_33] : memref<9x1x256xf32, #tpu.memory_space<vmem>>, vector<1x1x256xf32>
    %58 = vector.shape_cast %57 : vector<1x1x256xf32> to vector<1x256xf32>
    %59 = vector.broadcast %58 : vector<1x256xf32> to vector<8x256xf32>
    %60 = arith.mulf %56, %59 : vector<8x256xf32>
    %c16_i32_34 = arith.constant 16 : i32
    %61 = tpu.dynamic_rotate %53 by %c16_i32_34 dim 1 : vector<8x256xf32>, i32 -> vector<8x256xf32>
    %c1_35 = arith.constant 1 : index
    %c0_36 = arith.constant 0 : index
    %c0_37 = arith.constant 0 : index
    %62 = vector.load %arg6[%c1_35, %c0_36, %c0_37] : memref<9x1x256xf32, #tpu.memory_space<vmem>>, vector<1x1x256xf32>
    %63 = vector.shape_cast %62 : vector<1x1x256xf32> to vector<1x256xf32>
    %64 = vector.broadcast %63 : vector<1x256xf32> to vector<8x256xf32>
    %65 = arith.mulf %61, %64 : vector<8x256xf32>
    %c15_i32_38 = arith.constant 15 : i32
    %66 = tpu.dynamic_rotate %53 by %c15_i32_38 dim 1 : vector<8x256xf32>, i32 -> vector<8x256xf32>
    %c2_39 = arith.constant 2 : index
    %c0_40 = arith.constant 0 : index
    %c0_41 = arith.constant 0 : index
    %67 = vector.load %arg6[%c2_39, %c0_40, %c0_41] : memref<9x1x256xf32, #tpu.memory_space<vmem>>, vector<1x1x256xf32>
    %68 = vector.shape_cast %67 : vector<1x1x256xf32> to vector<1x256xf32>
    %69 = vector.broadcast %68 : vector<1x256xf32> to vector<8x256xf32>
    %70 = arith.mulf %66, %69 : vector<8x256xf32>
    %c1_i32_42 = arith.constant 1 : i32
    %71 = tpu.dynamic_rotate %53 by %c1_i32_42 dim 1 : vector<8x256xf32>, i32 -> vector<8x256xf32>
    %c3_43 = arith.constant 3 : index
    %c0_44 = arith.constant 0 : index
    %c0_45 = arith.constant 0 : index
    %72 = vector.load %arg6[%c3_43, %c0_44, %c0_45] : memref<9x1x256xf32, #tpu.memory_space<vmem>>, vector<1x1x256xf32>
    %73 = vector.shape_cast %72 : vector<1x1x256xf32> to vector<1x256xf32>
    %74 = vector.broadcast %73 : vector<1x256xf32> to vector<8x256xf32>
    %75 = arith.mulf %71, %74 : vector<8x256xf32>
    %c4_46 = arith.constant 4 : index
    %c0_47 = arith.constant 0 : index
    %c0_48 = arith.constant 0 : index
    %76 = vector.load %arg6[%c4_46, %c0_47, %c0_48] : memref<9x1x256xf32, #tpu.memory_space<vmem>>, vector<1x1x256xf32>
    %77 = vector.shape_cast %76 : vector<1x1x256xf32> to vector<1x256xf32>
    %78 = vector.broadcast %77 : vector<1x256xf32> to vector<8x256xf32>
    %79 = arith.mulf %53, %78 : vector<8x256xf32>
    %c255_i32_49 = arith.constant 255 : i32
    %80 = tpu.dynamic_rotate %53 by %c255_i32_49 dim 1 : vector<8x256xf32>, i32 -> vector<8x256xf32>
    %c5_50 = arith.constant 5 : index
    %c0_51 = arith.constant 0 : index
    %c0_52 = arith.constant 0 : index
    %81 = vector.load %arg6[%c5_50, %c0_51, %c0_52] : memref<9x1x256xf32, #tpu.memory_space<vmem>>, vector<1x1x256xf32>
    %82 = vector.shape_cast %81 : vector<1x1x256xf32> to vector<1x256xf32>
    %83 = vector.broadcast %82 : vector<1x256xf32> to vector<8x256xf32>
    %84 = arith.mulf %80, %83 : vector<8x256xf32>
    %c241_i32_53 = arith.constant 241 : i32
    %85 = tpu.dynamic_rotate %53 by %c241_i32_53 dim 1 : vector<8x256xf32>, i32 -> vector<8x256xf32>
    %c6_54 = arith.constant 6 : index
    %c0_55 = arith.constant 0 : index
    %c0_56 = arith.constant 0 : index
    %86 = vector.load %arg6[%c6_54, %c0_55, %c0_56] : memref<9x1x256xf32, #tpu.memory_space<vmem>>, vector<1x1x256xf32>
    %87 = vector.shape_cast %86 : vector<1x1x256xf32> to vector<1x256xf32>
    %88 = vector.broadcast %87 : vector<1x256xf32> to vector<8x256xf32>
    %89 = arith.mulf %85, %88 : vector<8x256xf32>
    %c240_i32_57 = arith.constant 240 : i32
    %90 = tpu.dynamic_rotate %53 by %c240_i32_57 dim 1 : vector<8x256xf32>, i32 -> vector<8x256xf32>
    %c7_58 = arith.constant 7 : index
    %c0_59 = arith.constant 0 : index
    %c0_60 = arith.constant 0 : index
    %91 = vector.load %arg6[%c7_58, %c0_59, %c0_60] : memref<9x1x256xf32, #tpu.memory_space<vmem>>, vector<1x1x256xf32>
    %92 = vector.shape_cast %91 : vector<1x1x256xf32> to vector<1x256xf32>
    %93 = vector.broadcast %92 : vector<1x256xf32> to vector<8x256xf32>
    %94 = arith.mulf %90, %93 : vector<8x256xf32>
    %c239_i32_61 = arith.constant 239 : i32
    %95 = tpu.dynamic_rotate %53 by %c239_i32_61 dim 1 : vector<8x256xf32>, i32 -> vector<8x256xf32>
    %c8_62 = arith.constant 8 : index
    %c0_63 = arith.constant 0 : index
    %c0_64 = arith.constant 0 : index
    %96 = vector.load %arg6[%c8_62, %c0_63, %c0_64] : memref<9x1x256xf32, #tpu.memory_space<vmem>>, vector<1x1x256xf32>
    %97 = vector.shape_cast %96 : vector<1x1x256xf32> to vector<1x256xf32>
    %98 = vector.broadcast %97 : vector<1x256xf32> to vector<8x256xf32>
    %99 = arith.mulf %95, %98 : vector<8x256xf32>
    %100 = tpu.concatenate %60, %65, %70, %75, %79, %84, %89, %94, %99 in 0 : vector<8x256xf32>, vector<8x256xf32>, vector<8x256xf32>, vector<8x256xf32>, vector<8x256xf32>, vector<8x256xf32>, vector<8x256xf32>, vector<8x256xf32>, vector<8x256xf32> -> vector<72x256xf32>
    %cst_65 = arith.constant dense<0.000000e+00> : vector<16x256xf32>
    %101 = tpu.matmul %54, %100, %cst_65 {dimension_numbers = #tpu.dot_dimension_numbers<[1], [0], [0], [1], [0, 0, 1, 1], [], []>} : vector<16x72xf32>, vector<72x256xf32>, vector<16x256xf32> -> vector<16x256xf32>
    %102 = vector.broadcast %55 : vector<16x1xf32> to vector<16x256xf32>
    %103 = arith.addf %101, %102 : vector<16x256xf32>
    %cst_66 = arith.constant 0.000000e+00 : f32
    %104 = vector.broadcast %cst_66 : f32 to vector<16x256xf32>
    %105 = arith.maximumf %103, %104 : vector<16x256xf32>
    %c0_67 = arith.constant 0 : index
    %c0_68 = arith.constant 0 : index
    %106 = vector.load %arg8[%c0_67, %c0_68] : memref<1x16xf32, #tpu.memory_space<vmem>>, vector<1x16xf32>
    %107 = vector.extract_strided_slice %105 {offsets = [0, 0], sizes = [1, 256], strides = [1, 1]} : vector<16x256xf32> to vector<1x256xf32>
    %c0_69 = arith.constant 0 : index
    %c0_70 = arith.constant 0 : index
    %c0_71 = arith.constant 0 : index
    %108 = vector.load %arg7[%c0_69, %c0_70, %c0_71] : memref<16x16x256xf32, #tpu.memory_space<vmem>>, vector<1x16x256xf32>
    %109 = vector.shape_cast %108 : vector<1x16x256xf32> to vector<16x256xf32>
    %cst_72 = arith.constant dense<0.000000e+00> : vector<1x16xf32>
    %110 = tpu.matmul %107, %109, %cst_72 {dimension_numbers = #tpu.dot_dimension_numbers<[1], [1], [0], [0], [0, 0, 1, 0], [], []>} : vector<1x256xf32>, vector<16x256xf32>, vector<1x16xf32> -> vector<1x16xf32>
    %111 = arith.addf %106, %110 : vector<1x16xf32>
    %112 = vector.extract_strided_slice %105 {offsets = [1, 0], sizes = [1, 256], strides = [1, 1]} : vector<16x256xf32> to vector<1x256xf32>
    %c1_73 = arith.constant 1 : index
    %c0_74 = arith.constant 0 : index
    %c0_75 = arith.constant 0 : index
    %113 = vector.load %arg7[%c1_73, %c0_74, %c0_75] : memref<16x16x256xf32, #tpu.memory_space<vmem>>, vector<1x16x256xf32>
    %114 = vector.shape_cast %113 : vector<1x16x256xf32> to vector<16x256xf32>
    %cst_76 = arith.constant dense<0.000000e+00> : vector<1x16xf32>
    %115 = tpu.matmul %112, %114, %cst_76 {dimension_numbers = #tpu.dot_dimension_numbers<[1], [1], [0], [0], [0, 0, 1, 0], [], []>} : vector<1x256xf32>, vector<16x256xf32>, vector<1x16xf32> -> vector<1x16xf32>
    %116 = arith.addf %111, %115 : vector<1x16xf32>
    %117 = vector.extract_strided_slice %105 {offsets = [2, 0], sizes = [1, 256], strides = [1, 1]} : vector<16x256xf32> to vector<1x256xf32>
    %c2_77 = arith.constant 2 : index
    %c0_78 = arith.constant 0 : index
    %c0_79 = arith.constant 0 : index
    %118 = vector.load %arg7[%c2_77, %c0_78, %c0_79] : memref<16x16x256xf32, #tpu.memory_space<vmem>>, vector<1x16x256xf32>
    %119 = vector.shape_cast %118 : vector<1x16x256xf32> to vector<16x256xf32>
    %cst_80 = arith.constant dense<0.000000e+00> : vector<1x16xf32>
    %120 = tpu.matmul %117, %119, %cst_80 {dimension_numbers = #tpu.dot_dimension_numbers<[1], [1], [0], [0], [0, 0, 1, 0], [], []>} : vector<1x256xf32>, vector<16x256xf32>, vector<1x16xf32> -> vector<1x16xf32>
    %121 = arith.addf %116, %120 : vector<1x16xf32>
    %122 = vector.extract_strided_slice %105 {offsets = [3, 0], sizes = [1, 256], strides = [1, 1]} : vector<16x256xf32> to vector<1x256xf32>
    %c3_81 = arith.constant 3 : index
    %c0_82 = arith.constant 0 : index
    %c0_83 = arith.constant 0 : index
    %123 = vector.load %arg7[%c3_81, %c0_82, %c0_83] : memref<16x16x256xf32, #tpu.memory_space<vmem>>, vector<1x16x256xf32>
    %124 = vector.shape_cast %123 : vector<1x16x256xf32> to vector<16x256xf32>
    %cst_84 = arith.constant dense<0.000000e+00> : vector<1x16xf32>
    %125 = tpu.matmul %122, %124, %cst_84 {dimension_numbers = #tpu.dot_dimension_numbers<[1], [1], [0], [0], [0, 0, 1, 0], [], []>} : vector<1x256xf32>, vector<16x256xf32>, vector<1x16xf32> -> vector<1x16xf32>
    %126 = arith.addf %121, %125 : vector<1x16xf32>
    %127 = vector.extract_strided_slice %105 {offsets = [4, 0], sizes = [1, 256], strides = [1, 1]} : vector<16x256xf32> to vector<1x256xf32>
    %c4_85 = arith.constant 4 : index
    %c0_86 = arith.constant 0 : index
    %c0_87 = arith.constant 0 : index
    %128 = vector.load %arg7[%c4_85, %c0_86, %c0_87] : memref<16x16x256xf32, #tpu.memory_space<vmem>>, vector<1x16x256xf32>
    %129 = vector.shape_cast %128 : vector<1x16x256xf32> to vector<16x256xf32>
    %cst_88 = arith.constant dense<0.000000e+00> : vector<1x16xf32>
    %130 = tpu.matmul %127, %129, %cst_88 {dimension_numbers = #tpu.dot_dimension_numbers<[1], [1], [0], [0], [0, 0, 1, 0], [], []>} : vector<1x256xf32>, vector<16x256xf32>, vector<1x16xf32> -> vector<1x16xf32>
    %131 = arith.addf %126, %130 : vector<1x16xf32>
    %132 = vector.extract_strided_slice %105 {offsets = [5, 0], sizes = [1, 256], strides = [1, 1]} : vector<16x256xf32> to vector<1x256xf32>
    %c5_89 = arith.constant 5 : index
    %c0_90 = arith.constant 0 : index
    %c0_91 = arith.constant 0 : index
    %133 = vector.load %arg7[%c5_89, %c0_90, %c0_91] : memref<16x16x256xf32, #tpu.memory_space<vmem>>, vector<1x16x256xf32>
    %134 = vector.shape_cast %133 : vector<1x16x256xf32> to vector<16x256xf32>
    %cst_92 = arith.constant dense<0.000000e+00> : vector<1x16xf32>
    %135 = tpu.matmul %132, %134, %cst_92 {dimension_numbers = #tpu.dot_dimension_numbers<[1], [1], [0], [0], [0, 0, 1, 0], [], []>} : vector<1x256xf32>, vector<16x256xf32>, vector<1x16xf32> -> vector<1x16xf32>
    %136 = arith.addf %131, %135 : vector<1x16xf32>
    %137 = vector.extract_strided_slice %105 {offsets = [6, 0], sizes = [1, 256], strides = [1, 1]} : vector<16x256xf32> to vector<1x256xf32>
    %c6_93 = arith.constant 6 : index
    %c0_94 = arith.constant 0 : index
    %c0_95 = arith.constant 0 : index
    %138 = vector.load %arg7[%c6_93, %c0_94, %c0_95] : memref<16x16x256xf32, #tpu.memory_space<vmem>>, vector<1x16x256xf32>
    %139 = vector.shape_cast %138 : vector<1x16x256xf32> to vector<16x256xf32>
    %cst_96 = arith.constant dense<0.000000e+00> : vector<1x16xf32>
    %140 = tpu.matmul %137, %139, %cst_96 {dimension_numbers = #tpu.dot_dimension_numbers<[1], [1], [0], [0], [0, 0, 1, 0], [], []>} : vector<1x256xf32>, vector<16x256xf32>, vector<1x16xf32> -> vector<1x16xf32>
    %141 = arith.addf %136, %140 : vector<1x16xf32>
    %142 = vector.extract_strided_slice %105 {offsets = [7, 0], sizes = [1, 256], strides = [1, 1]} : vector<16x256xf32> to vector<1x256xf32>
    %c7_97 = arith.constant 7 : index
    %c0_98 = arith.constant 0 : index
    %c0_99 = arith.constant 0 : index
    %143 = vector.load %arg7[%c7_97, %c0_98, %c0_99] : memref<16x16x256xf32, #tpu.memory_space<vmem>>, vector<1x16x256xf32>
    %144 = vector.shape_cast %143 : vector<1x16x256xf32> to vector<16x256xf32>
    %cst_100 = arith.constant dense<0.000000e+00> : vector<1x16xf32>
    %145 = tpu.matmul %142, %144, %cst_100 {dimension_numbers = #tpu.dot_dimension_numbers<[1], [1], [0], [0], [0, 0, 1, 0], [], []>} : vector<1x256xf32>, vector<16x256xf32>, vector<1x16xf32> -> vector<1x16xf32>
    %146 = arith.addf %141, %145 : vector<1x16xf32>
    %147 = vector.extract_strided_slice %105 {offsets = [8, 0], sizes = [1, 256], strides = [1, 1]} : vector<16x256xf32> to vector<1x256xf32>
    %c8_101 = arith.constant 8 : index
    %c0_102 = arith.constant 0 : index
    %c0_103 = arith.constant 0 : index
    %148 = vector.load %arg7[%c8_101, %c0_102, %c0_103] : memref<16x16x256xf32, #tpu.memory_space<vmem>>, vector<1x16x256xf32>
    %149 = vector.shape_cast %148 : vector<1x16x256xf32> to vector<16x256xf32>
    %cst_104 = arith.constant dense<0.000000e+00> : vector<1x16xf32>
    %150 = tpu.matmul %147, %149, %cst_104 {dimension_numbers = #tpu.dot_dimension_numbers<[1], [1], [0], [0], [0, 0, 1, 0], [], []>} : vector<1x256xf32>, vector<16x256xf32>, vector<1x16xf32> -> vector<1x16xf32>
    %151 = arith.addf %146, %150 : vector<1x16xf32>
    %152 = vector.extract_strided_slice %105 {offsets = [9, 0], sizes = [1, 256], strides = [1, 1]} : vector<16x256xf32> to vector<1x256xf32>
    %c9 = arith.constant 9 : index
    %c0_105 = arith.constant 0 : index
    %c0_106 = arith.constant 0 : index
    %153 = vector.load %arg7[%c9, %c0_105, %c0_106] : memref<16x16x256xf32, #tpu.memory_space<vmem>>, vector<1x16x256xf32>
    %154 = vector.shape_cast %153 : vector<1x16x256xf32> to vector<16x256xf32>
    %cst_107 = arith.constant dense<0.000000e+00> : vector<1x16xf32>
    %155 = tpu.matmul %152, %154, %cst_107 {dimension_numbers = #tpu.dot_dimension_numbers<[1], [1], [0], [0], [0, 0, 1, 0], [], []>} : vector<1x256xf32>, vector<16x256xf32>, vector<1x16xf32> -> vector<1x16xf32>
    %156 = arith.addf %151, %155 : vector<1x16xf32>
    %157 = vector.extract_strided_slice %105 {offsets = [10, 0], sizes = [1, 256], strides = [1, 1]} : vector<16x256xf32> to vector<1x256xf32>
    %c10 = arith.constant 10 : index
    %c0_108 = arith.constant 0 : index
    %c0_109 = arith.constant 0 : index
    %158 = vector.load %arg7[%c10, %c0_108, %c0_109] : memref<16x16x256xf32, #tpu.memory_space<vmem>>, vector<1x16x256xf32>
    %159 = vector.shape_cast %158 : vector<1x16x256xf32> to vector<16x256xf32>
    %cst_110 = arith.constant dense<0.000000e+00> : vector<1x16xf32>
    %160 = tpu.matmul %157, %159, %cst_110 {dimension_numbers = #tpu.dot_dimension_numbers<[1], [1], [0], [0], [0, 0, 1, 0], [], []>} : vector<1x256xf32>, vector<16x256xf32>, vector<1x16xf32> -> vector<1x16xf32>
    %161 = arith.addf %156, %160 : vector<1x16xf32>
    %162 = vector.extract_strided_slice %105 {offsets = [11, 0], sizes = [1, 256], strides = [1, 1]} : vector<16x256xf32> to vector<1x256xf32>
    %c11 = arith.constant 11 : index
    %c0_111 = arith.constant 0 : index
    %c0_112 = arith.constant 0 : index
    %163 = vector.load %arg7[%c11, %c0_111, %c0_112] : memref<16x16x256xf32, #tpu.memory_space<vmem>>, vector<1x16x256xf32>
    %164 = vector.shape_cast %163 : vector<1x16x256xf32> to vector<16x256xf32>
    %cst_113 = arith.constant dense<0.000000e+00> : vector<1x16xf32>
    %165 = tpu.matmul %162, %164, %cst_113 {dimension_numbers = #tpu.dot_dimension_numbers<[1], [1], [0], [0], [0, 0, 1, 0], [], []>} : vector<1x256xf32>, vector<16x256xf32>, vector<1x16xf32> -> vector<1x16xf32>
    %166 = arith.addf %161, %165 : vector<1x16xf32>
    %167 = vector.extract_strided_slice %105 {offsets = [12, 0], sizes = [1, 256], strides = [1, 1]} : vector<16x256xf32> to vector<1x256xf32>
    %c12 = arith.constant 12 : index
    %c0_114 = arith.constant 0 : index
    %c0_115 = arith.constant 0 : index
    %168 = vector.load %arg7[%c12, %c0_114, %c0_115] : memref<16x16x256xf32, #tpu.memory_space<vmem>>, vector<1x16x256xf32>
    %169 = vector.shape_cast %168 : vector<1x16x256xf32> to vector<16x256xf32>
    %cst_116 = arith.constant dense<0.000000e+00> : vector<1x16xf32>
    %170 = tpu.matmul %167, %169, %cst_116 {dimension_numbers = #tpu.dot_dimension_numbers<[1], [1], [0], [0], [0, 0, 1, 0], [], []>} : vector<1x256xf32>, vector<16x256xf32>, vector<1x16xf32> -> vector<1x16xf32>
    %171 = arith.addf %166, %170 : vector<1x16xf32>
    %172 = vector.extract_strided_slice %105 {offsets = [13, 0], sizes = [1, 256], strides = [1, 1]} : vector<16x256xf32> to vector<1x256xf32>
    %c13 = arith.constant 13 : index
    %c0_117 = arith.constant 0 : index
    %c0_118 = arith.constant 0 : index
    %173 = vector.load %arg7[%c13, %c0_117, %c0_118] : memref<16x16x256xf32, #tpu.memory_space<vmem>>, vector<1x16x256xf32>
    %174 = vector.shape_cast %173 : vector<1x16x256xf32> to vector<16x256xf32>
    %cst_119 = arith.constant dense<0.000000e+00> : vector<1x16xf32>
    %175 = tpu.matmul %172, %174, %cst_119 {dimension_numbers = #tpu.dot_dimension_numbers<[1], [1], [0], [0], [0, 0, 1, 0], [], []>} : vector<1x256xf32>, vector<16x256xf32>, vector<1x16xf32> -> vector<1x16xf32>
    %176 = arith.addf %171, %175 : vector<1x16xf32>
    %177 = vector.extract_strided_slice %105 {offsets = [14, 0], sizes = [1, 256], strides = [1, 1]} : vector<16x256xf32> to vector<1x256xf32>
    %c14 = arith.constant 14 : index
    %c0_120 = arith.constant 0 : index
    %c0_121 = arith.constant 0 : index
    %178 = vector.load %arg7[%c14, %c0_120, %c0_121] : memref<16x16x256xf32, #tpu.memory_space<vmem>>, vector<1x16x256xf32>
    %179 = vector.shape_cast %178 : vector<1x16x256xf32> to vector<16x256xf32>
    %cst_122 = arith.constant dense<0.000000e+00> : vector<1x16xf32>
    %180 = tpu.matmul %177, %179, %cst_122 {dimension_numbers = #tpu.dot_dimension_numbers<[1], [1], [0], [0], [0, 0, 1, 0], [], []>} : vector<1x256xf32>, vector<16x256xf32>, vector<1x16xf32> -> vector<1x16xf32>
    %181 = arith.addf %176, %180 : vector<1x16xf32>
    %182 = vector.extract_strided_slice %105 {offsets = [15, 0], sizes = [1, 256], strides = [1, 1]} : vector<16x256xf32> to vector<1x256xf32>
    %c15 = arith.constant 15 : index
    %c0_123 = arith.constant 0 : index
    %c0_124 = arith.constant 0 : index
    %183 = vector.load %arg7[%c15, %c0_123, %c0_124] : memref<16x16x256xf32, #tpu.memory_space<vmem>>, vector<1x16x256xf32>
    %184 = vector.shape_cast %183 : vector<1x16x256xf32> to vector<16x256xf32>
    %cst_125 = arith.constant dense<0.000000e+00> : vector<1x16xf32>
    %185 = tpu.matmul %182, %184, %cst_125 {dimension_numbers = #tpu.dot_dimension_numbers<[1], [1], [0], [0], [0, 0, 1, 0], [], []>} : vector<1x256xf32>, vector<16x256xf32>, vector<1x16xf32> -> vector<1x16xf32>
    %186 = arith.addf %181, %185 : vector<1x16xf32>
    %c0_126 = arith.constant 0 : index
    %c0_127 = arith.constant 0 : index
    %c0_128 = arith.constant 0 : index
    %187 = vector.load %arg9[%c0_126, %c0_127, %c0_128] : memref<1x1x16xf32, #tpu.memory_space<vmem>>, vector<1x1x16xf32>
    %188 = vector.shape_cast %187 : vector<1x1x16xf32> to vector<1x16xf32>
    %189 = vector.shape_cast %186 : vector<1x16xf32> to vector<1x1x16xf32>
    tpu.vector_store %arg9[%c0_126, %c0_127, %c0_128], %189 {strides = array<i32>} : memref<1x1x16xf32, #tpu.memory_space<vmem>>, vector<1x1x16xf32>,
    return
  }
  func.func @transform_0(%arg0: i32) -> (i32, i32, i32) {
    %c0_i32 = arith.constant 0 : i32
    %c0_i32_0 = arith.constant 0 : i32
    %c0_i32_1 = arith.constant 0 : i32
    return %arg0, %c0_i32, %c0_i32_0 : i32, i32, i32
  }
  func.func @transform_1(%arg0: i32) -> (i32, i32) {
    %c0_i32 = arith.constant 0 : i32
    %c0_i32_0 = arith.constant 0 : i32
    %c0_i32_1 = arith.constant 0 : i32
    return %c0_i32, %c0_i32_0 : i32, i32
  }
  func.func @transform_2(%arg0: i32) -> (i32, i32) {
    %c0_i32 = arith.constant 0 : i32
    %c0_i32_0 = arith.constant 0 : i32
    %c0_i32_1 = arith.constant 0 : i32
    return %c0_i32, %c0_i32_0 : i32, i32
  }
  func.func @transform_3(%arg0: i32) -> (i32, i32) {
    %c0_i32 = arith.constant 0 : i32
    %c0_i32_0 = arith.constant 0 : i32
    %c0_i32_1 = arith.constant 0 : i32
    return %c0_i32, %c0_i32_0 : i32, i32
  }
  func.func @transform_4(%arg0: i32) -> (i32, i32) {
    %c0_i32 = arith.constant 0 : i32
    %c0_i32_0 = arith.constant 0 : i32
    %c0_i32_1 = arith.constant 0 : i32
    return %c0_i32, %c0_i32_0 : i32, i32
  }
  func.func @transform_5(%arg0: i32) -> (i32, i32, i32) {
    %c0_i32 = arith.constant 0 : i32
    %c0_i32_0 = arith.constant 0 : i32
    %c0_i32_1 = arith.constant 0 : i32
    %c0_i32_2 = arith.constant 0 : i32
    return %c0_i32, %c0_i32_0, %c0_i32_1 : i32, i32, i32
  }
  func.func @transform_6(%arg0: i32) -> (i32, i32, i32) {
    %c0_i32 = arith.constant 0 : i32
    %c0_i32_0 = arith.constant 0 : i32
    %c0_i32_1 = arith.constant 0 : i32
    %c0_i32_2 = arith.constant 0 : i32
    return %c0_i32, %c0_i32_0, %c0_i32_1 : i32, i32, i32
  }
  func.func @transform_7(%arg0: i32) -> (i32, i32) {
    %c0_i32 = arith.constant 0 : i32
    %c0_i32_0 = arith.constant 0 : i32
    %c0_i32_1 = arith.constant 0 : i32
    return %c0_i32, %c0_i32_0 : i32, i32
  }
  func.func @transform_8(%arg0: i32) -> (i32, i32, i32) {
    %c0_i32 = arith.constant 0 : i32
    %c0_i32_0 = arith.constant 0 : i32
    %c0_i32_1 = arith.constant 0 : i32
    return %arg0, %c0_i32, %c0_i32_0 : i32, i32, i32
  }
}

</mosaic_0001>

<bundles_post_ra>
// kernel: tpu_custom_call.1
= control target key start
LH: loop header
LB: loop body
LE: loop exit
PB: predicated region body
PF: predicated region fallthrough
CT: control target
= control target key end

     0   :  { %13 = vsyncpa [#allocation3], 0  ;;  %s3158_s0 = inlined_call_operand.hbm [shape: f32[2,8,256], index: 0, kind: input, shape index: {}]   ;;  %s3159_s1 = inlined_call_operand.hbm [shape: f32[8,72], index: 1, kind: input, shape index: {}]   ;;  %s3160_s2 = inlined_call_operand.vmem [shape: f32[8,1], index: 2, kind: input, shape index: {}]   ;;  %s3161_s3 = inlined_call_operand.vmem [shape: f32[16,72], index: 3, kind: input, shape index: {}]   ;;  %s3162_s4 = inlined_call_operand.vmem [shape: f32[16,1], index: 4, kind: input, shape index: {}]   ;;  %s3163_s5 = inlined_call_operand.vmem [shape: f32[9,1,256], index: 5, kind: input, shape index: {}]   ;;  %s3164_s6 = inlined_call_operand.hbm [shape: f32[16,16,256], index: 6, kind: input, shape index: {}]   ;;  %s3165_s7 = inlined_call_operand.vmem [shape: f32[1,16], index: 7, kind: input, shape index: {}]   ;;  %s3166_s8 = inlined_call_operand.hbm [shape: f32[2,1,16], index: 8, kind: output, shape index: {}]  }
   0x1   :  { %15 = vsyncpa [#allocation3 + $0x1], 0 }
   0x2   :  { %16 = vsyncpa [#allocation6], 0 }
   0x3   :  { %17 = vsyncpa [#allocation4], 0 }
   0x4   :  { %19 = vsyncpa [#allocation4 + $0x1], 0  ;;  %s2622_s27 = smov 0   ;;  %s2624_s28 = smov 0  }
   0x5   :  { %s2626_s29 = smov 0   ;;  %s2628_s30 = smov 0  }
   0x6 LB: > { %s2643_s9 = sadd.s32 4294967295, %s2559_s30   ;;  %s2169_s10 = sadd.s32 4294967294, %s2559_s30   ;;  %s2559_s30 = sphi %s2628_s30, %s3192_s30   ;;  %s2555_s29 = sphi %s2626_s29, %s3191_s29   ;;  %s2551_s28 = sphi %s2624_s28, %s3190_s28   ;;  %s2547_s27 = sphi %s2622_s27, %s3189_s27  }
   0x7   : > { %p45_p0 = scmp.ne.s32.totalorder %s2551_s28, %s2547_s27  ;;  %p3167_p1 = scmp.eq.s32.totalorder %s2643_s9, 0 }
   0x8   : > { %p222_p3 = scmp.eq.s32.totalorder %s2169_s10, 1  ;;  %p2170_p5 = scmp.ge.s32.totalorder %s2559_s30, 1 }
   0x9   : > { %p2652_p4 = por %p3167_p1, %p45_p0  ;;  %p229_p7 = scmp.lt.s32.totalorder %s2559_s30, 3 }
   0xa   : > { %p2657_p6 = por %p222_p3, %p45_p0  ;;  %s2561_s14 = smov [#allocation5]  }
   0xb   : > { %s3174_s11 = scalar_select %p2652_p4, 1, 0 }
   0xc   : > { %s3175_s12 = scalar_select %p2657_p6, 1, 0 }
   0xd   : > { %p2662_p8 = pnand %p2170_p5, %p229_p7  ;;  %s242_s15 = sshll.u32 %s2561_s14, 4  ;;  %s243_s15 = int_to_ptr.vmem [resolvable:$true] %s242_s15 }
   0xe   : > { %s2562_s16 = smov [#allocation7]   ;;  %s2403_s21 = scalar_lea.hbm %s3159_s1, 128 }
   0xf   : > { %s3176_s13 = scalar_select %p2662_p8, 1, 0 }
  0x10   : > { %p2334_p10 = pneg %p2662_p8  ;;  %s264_s17 = sshll.u32 %s2562_s16, 4  ;;  %s2675_s17 = int_to_ptr.vmem [resolvable:$true] %s264_s17 }
  0x11   : > { %p2404_p12 = scmp.ne.s32.totalorder %s3159_s1, %s2403_s21  ;;  %p2410_p5 = scmp.lt.u32.totalorder %s2403_s21, %s3159_s1 }
  0x12   : > { %p2671_p11 = pnand %p2334_p10, %p3167_p1 }
  0x14   : > { %p2405_p13 = pneg %p2671_p11 }
  0x16   : > { %p2406_p0 = pnand %p2405_p13, %p2404_p12 }
  0x18   : > { %p2407_p3 = pneg %p2406_p0 }
  0x1a   : > { %p2412_p7 = pnand %p2410_p5, %p2407_p3 }
  0x1c   : > { %2415 = shalt.err (!%p2412_p7)
}
  0x1d   : > { %s2416_s26 = scalar_lea.vmem %s243_s15, 128  ;;  %p2424_p2 = scmp.lt.s32.totalorder %s243_s15, %s243_s15 }
  0x1e   : > { %p2417_p10 = scmp.ne.s32.totalorder %s243_s15, %s2416_s26  ;;  %p2425_p6 = scmp.lt.s32.totalorder %s2416_s26, %s2416_s26 }
  0x20   : > { %p2419_p9 = pnand %p2417_p10, %p2405_p13  ;;  %p2426_p4 = por %p2425_p6, %p2424_p2 }
  0x22   : > { %p2420_p1 = pneg %p2419_p9 }
  0x24   : > { %p2427_p8 = pnand %p2426_p4, %p2420_p1 }
  0x26   : > { %2430 = shalt.err (!%p2427_p8)
}
  0x27   : > { %2337 = dma.hbm_to_vmem [thread:$0]  (!%p2671_p11), %s3159_s1, 128, %s243_s15, [#allocation6]  }
  0x28   : > { %s2431_s20 = scalar_lea.hbm %s3164_s6, 8192 }
  0x29   : > { %p2432_p9 = scmp.ne.s32.totalorder %s3164_s6, %s2431_s20  ;;  %p2438_p4 = scmp.lt.u32.totalorder %s2431_s20, %s3164_s6 }
  0x2b   : > { %p2434_p2 = pnand %p2432_p9, %p2405_p13 }
  0x2d   : > { %p2435_p1 = pneg %p2434_p2 }
  0x2f   : > { %p2440_p6 = pnand %p2438_p4, %p2435_p1 }
  0x31   : > { %2443 = shalt.err (!%p2440_p6)
}
  0x32   : > { %s2444_s15 = scalar_lea.vmem %s2675_s17, 8192  ;;  %p2452_p3 = scmp.lt.s32.totalorder %s2675_s17, %s2675_s17 }
  0x33   : > { %p2445_p8 = scmp.ne.s32.totalorder %s2675_s17, %s2444_s15  ;;  %p2453_p5 = scmp.lt.s32.totalorder %s2444_s15, %s2444_s15 }
  0x35   : > { %p2447_p12 = pnand %p2445_p8, %p2405_p13  ;;  %p2454_p7 = por %p2453_p5, %p2452_p3 }
  0x37   : > { %p2448_p0 = pneg %p2447_p12 }
  0x39   : > { %p2455_p10 = pnand %p2454_p7, %p2448_p0 }
  0x3b   : > { %2458 = shalt.err (!%p2455_p10)
}
  0x3c   : > { %s2563_s25 = smov 256   ;;  %s2564_s26 = smov 16  }
  0x3d   : > { %2340 = dma.hbm_to_vmem [thread:$0]  (!%p2671_p11), %s3164_s6, 8192, %s2675_s17, [#allocation6], %s2563_s25, %s2563_s25, %s2564_s26  }
  0x3e   : > { %s2725_s16 = sadd.s32 1, %s2559_s30   ;;  %s32_s19 = sadd.s32 1, %s2555_s29 }
  0x3f   : > { %s29_s20 = ssub.s32 %s2559_s30, %s2725_s16  ;;  %p39_p13 = scmp.ne.s32.totalorder %s2555_s29, %s2551_s28 }
  0x40   : > { %p30_p9 = scmp.eq.s32.totalorder %s29_s20, 0  ;;  %p40_p2 = scmp.eq.s32.totalorder %s2559_s30, 0 }
  0x41   : > { %p3178_p1 = scmp.eq.s32.totalorder %s2643_s9, 1  ;;  %p2351_p6 = scmp.lt.s32.totalorder %s2559_s30, 2 }
  0x42   : > { %s2741_s22 = scalar_select %p30_p9, %s2555_s29, %s32_s19  }
  0x43   : > { %p2735_p4 = por %p3178_p1, %p39_p13  ;;  %p41_p8 = por %p40_p2, %p39_p13 }
  0x44   : > { %s281_s18 = sand.u32 1, %s2555_s29   ;;  %s2195_s17 = sshll.u32 %s2559_s30, 8 }
  0x45   : > { %s2174_s23 = sshll.u32 %s281_s18, 4  ;;  %s2748_s25 = scalar_lea.hbm %s3158_s0, %s2195_s17 }
  0x46   : > { %s285_s26 = scalar_lea.vmem [#allocation2], %s2174_s23  ;;  %p2752_p11 = pnand %p2351_p6, %p41_p8 }
  0x47   : > { %s293_s10 = sshll.u32 %s285_s26, 4  ;;  %s282_s19 = scalar_lea.sflag [#allocation3], %s281_s18  ;;  %s2750_s10 = int_to_ptr.vmem [resolvable:$true] %s293_s10 }
  0x48   : > { %s2459_s20 = scalar_lea.hbm %s2748_s25, 256  ;;  %p2461_p0 = pneg %p2752_p11 }
  0x49   : > { %p2460_p12 = scmp.ne.s32.totalorder %s2748_s25, %s2459_s20  ;;  %s2464_s24 = scalar_lea.hbm %s3158_s0, 512 }
  0x4a   : > { %p2465_p7 = scmp.lt.u32.totalorder %s2748_s25, %s3158_s0  ;;  %p2466_p10 = scmp.lt.u32.totalorder %s2464_s24, %s2459_s20 }
  0x4b   : > { %p2462_p3 = pnand %p2461_p0, %p2460_p12  ;;  %p2468_p9 = scmp.lt.u32.totalorder %s2459_s20, %s2748_s25 }
  0x4c   : > { %p2467_p13 = por %p2466_p10, %p2465_p7 }
  0x4d   : > { %p2463_p5 = pneg %p2462_p3 }
  0x4e   : > { %p2469_p2 = por %p2468_p9, %p2467_p13 }
  0x50   : > { %p2470_p1 = pnand %p2469_p2, %p2463_p5 }
  0x52   : > { %2473 = shalt.err (!%p2470_p1)
}
  0x53   : > { %s2474_s18 = scalar_lea.vmem %s2750_s10, 256  ;;  %s2565_s17 = smov [#allocation2]  }
  0x54   : > { %p2475_p6 = scmp.ne.s32.totalorder %s2750_s10, %s2474_s18  ;;  %s2479_s23 = sshll.u32 %s2565_s17, 4  ;;  %s2480_s23 = int_to_ptr.vmem [resolvable:$false] %s2479_s23 }
  0x55   : > { %s2481_s15 = scalar_lea.vmem %s2480_s23, 512  ;;  %p2482_p3 = scmp.lt.s32.totalorder %s2750_s10, %s2480_s23 }
  0x56   : > { %p2477_p8 = pnand %p2475_p6, %p2461_p0  ;;  %p2483_p7 = scmp.lt.s32.totalorder %s2481_s15, %s2474_s18 }
  0x58   : > { %p2478_p12 = pneg %p2477_p8  ;;  %p2484_p10 = por %p2483_p7, %p2482_p3 }
  0x5a   : > { %p2485_p13 = pnand %p2484_p10, %p2478_p12 }
  0x5c   : > { %2488 = shalt.err (!%p2485_p13)
}
  0x5d   : > { %2344 = dma.hbm_to_vmem [thread:$0]  (!%p2752_p11), %s2748_s25, 256, %s2750_s10, %s282_s19  }
  0x5e   : > { %p3181_p5 = scmp.ne.s32.totalorder %s3176_s13, 0 }
  0x5f   : > { %s2784_s20 = sand.u32 (!%p3181_p5), 1, %s2551_s28   ;;  %p3182_p0 = scmp.ne.s32.totalorder (!%p3181_p5), %s3174_s11, 0 }
  0x60   : > { %302 = sbr.rel (%p3181_p5) target bundleno = 1149 (0x47d), region = 52  ;;  %s2178_s24 = sshll.u32 (!%p3181_p5), %s2784_s20, 4 }
  0x61   : > { %s305_s26 = scalar_lea.sflag (!%p3181_p5), [#allocation3], %s2784_s20  ;;  %s308_s18 = scalar_lea.vmem (!%p3181_p5), [#allocation2], %s2178_s24 }
  0x67   : > { %2534 = dma.done.wait (%p3182_p0), %s305_s26, 256  }
  0x68   : > { %2536 = vsyncadd (%p3182_p0), %s305_s26, 4294967040  ;;  %p3183_p9 = scmp.eq.s32.totalorder %s2643_s9, 0 }
  0x6a   : > { %2538 = dma.done.wait (%p3183_p9), [#allocation6], 8320   ;;  %p3184_p11 = pmov %p3183_p9 }
  0x6b   : > { %v2796_v0 = vld [vmem:[%s308_s18] sm:$0xff]  ;;  %s2566_s13 = smov 16   ;;  %s2567_s25 = smov 17   ;;  %v2802_v1 = vld [vmem:[%s308_s18 + $0x8] sm:$0xff]  ;;  %v2572_v2 = vmov 0.0   ;;  %v2573_v3 = vmov 0   ;;  %v356_v5 = vlaneseq }
  0x6c   : > { %2540 = vsyncadd (%p3184_p11), [#allocation6], 4294958976  ;;  %375 = vrot.lane.b32.xlu1 %v2796_v0, %s2566_s13  ;;  %352 = vrot.lane.b32.xlu0 %v2796_v0, %s2567_s25  ;;  %s2568_s11 = smov 15   ;;  %s2569_s10 = smov 1   ;;  %v351_v4 = vld [vmem:[%s3160_s2] sm:$0xff]  ;;  %vm549_vm8 = vcmask 588800  }
  0x6d   : > { %s2570_s14 = smov 127   ;;  %s3172_s19 = smov 113   ;;  %617 = vmatprep.mubr.f32.mxu1 %v2572_v2  ;;  %2401 = vset.pattern.permute.xlu0 %v2573_v3  ;;  %v364_v6 = vshrl.u32 %v356_v5, 7  ;;  %v2836_v7 = vand.u32 127, %v356_v5  ;;  %v2181_v10 = vld [vmem:[%s3163_s5 + $0x2] sm:$0x3] }
  0x6e   : > { %2402 = vset.pattern.permute.xlu1 %v2573_v3  ;;  %s3170_s17 = smov 112   ;;  %s2575_s23 = smov 111   ;;  %v361_v11 = vld [vmem:[%s3163_s5] sm:$0x3]  ;;  %v2182_v28 = vld [vmem:[%s3163_s5 + $0x4] sm:$0x3] }
  0x6f   : > { %v2838_v8 = vsub.s32 0, %v364_v6  ;;  %v2840_v9 = vsub.s32 1, %v364_v6  ;;  %vm379_vm0 = vcmp.lt.s32.totalorder %v2836_v7, 16  ;;  %vm358_vm1 = vcmp.lt.s32.totalorder %v2836_v7, 17  ;;  %v2183_v29 = vld [vmem:[%s3163_s5 + $0x6] sm:$0x3] }
  0x70   : > { %377 = vrot.lane.b32.xlu1 %v2802_v1, %s2566_s13  ;;  %354 = vrot.lane.b32.xlu0 %v2802_v1, %s2567_s25  ;;  %vm401_vm2 = vcmp.lt.s32.totalorder %v2836_v7, 15  ;;  %vm423_vm3 = vcmp.lt.s32.totalorder %v2836_v7, 1  ;;  %v2184_v34 = vld [vmem:[%s3163_s5 + $0x8] sm:$0x3]  ;;  %v2185_v39 = vld [vmem:[%s3163_s5 + $0xa] sm:$0x3] }
  0x71   : > { %v2851_v14 = vrot.slane %v2181_v10, %v2838_v8  ;;  %v2854_v15 = vrot.slane %v361_v11, %v2838_v8  ;;  %v2857_v16 = vrot.slane %v361_v11, %v2840_v9  ;;  %v2860_v17 = vrot.slane %v2181_v10, %v2840_v9  ;;  %v2186_v3 = vld [vmem:[%s3163_s5 + $0xc] sm:$0x3]  ;;  %s3185_s15 = smov 113   ;;  %s3186_s24 = smov 112  }
  0x72   : > { %v2886_v35 = vrot.slane %v2182_v28, %v2838_v8  ;;  %v2889_v36 = vrot.slane %v2182_v28, %v2840_v9  ;;  %v2892_v37 = vrot.slane %v2183_v29, %v2838_v8  ;;  %v2895_v38 = vrot.slane %v2183_v29, %v2840_v9 }
  0x73   : > { %vm460_vm4 = vcmp.lt.s32.totalorder %v2836_v7, 127  ;;  %v2906_v44 = vrot.slane %v2184_v34, %v2840_v9  ;;  %v2909_v45 = vrot.slane %v2184_v34, %v2838_v8  ;;  %v2916_v48 = vrot.slane %v2185_v39, %v2838_v8 }
  0x74   : > { %399 = vrot.lane.b32.xlu1 %v2802_v1, %s2568_s11  ;;  %397 = vrot.lane.b32.xlu0 %v2796_v0, %s2568_s11  ;;  %v2919_v49 = vrot.slane %v2185_v39, %v2840_v9  ;;  %vm482_vm5 = vcmp.lt.s32.totalorder %v2836_v7, 113  ;;  %v2943_v10 = vrot.slane %v2186_v3, %v2838_v8  ;;  %v2946_v11 = vrot.slane %v2186_v3, %v2840_v9 }
  0x75   : > { %v455_v58 = vmul.f32 %v2906_v44, %v2802_v1  ;;  %v454_v59 = vmul.f32 %v2909_v45, %v2796_v0  ;;  %vm504_vm6 = vcmp.lt.s32.totalorder %v2836_v7, 112  ;;  %vm526_vm7 = vcmp.lt.s32.totalorder %v2836_v7, 111  ;;  %v627_v7 = vld [vmem:[%s3161_s3 + $0x8] sm:$0xff] }
  0x76   : > { %vm2069_vm9 = vcmask 122880  }
  0x78   : > { %421 = vrot.lane.b32.xlu1 %v2802_v1, %s2569_s10  ;;  %419 = vrot.lane.b32.xlu0 %v2796_v0, %s2569_s10 }
  0x7c   : > { %458 = vrot.lane.b32.xlu1 %v2802_v1, %s2570_s14  ;;  %456 = vrot.lane.b32.xlu0 %v2796_v0, %s2570_s14 }
  0x80   : > { %480 = vrot.lane.b32.xlu1 %v2802_v1, %s3172_s19  ;;  %478 = vrot.lane.b32.xlu0 %v2796_v0, %s3172_s19 }
  0x84   : > { %502 = vrot.lane.b32.xlu1 %v2802_v1, %s3170_s17  ;;  %500 = vrot.lane.b32.xlu0 %v2796_v0, %s3170_s17 }
  0x88   : > { %524 = vrot.lane.b32.xlu1 %v2802_v1, %s2575_s23  ;;  %522 = vrot.lane.b32.xlu0 %v2796_v0, %s2575_s23  ;;  %v2187_v0 = vld [vmem:[%s3163_s5 + $0xe] sm:$0x3] }
  0x8c   : > { %546 = vperm.xlu0 %2401, %v351_v4  }
  0xde   : > { %v376_v12 = vpop.permute.xlu1 %375  ;;  %v353_v13 = vpop.permute.xlu0 %352 }
  0xe2   : > { %v378_v18 = vpop.permute.xlu1 %377  ;;  %v355_v19 = vpop.permute.xlu0 %354 }
  0xe3   : > { %v380_v20 = vsel %vm379_vm0, %v376_v12, %v378_v18  ;;  %v381_v21 = vsel %vm379_vm0, %v378_v18, %v376_v12  ;;  %v359_v22 = vsel %vm358_vm1, %v353_v13, %v355_v19  ;;  %v360_v23 = vsel %vm358_vm1, %v355_v19, %v353_v13  ;;  %v2188_v18 = vld [vmem:[%s3163_s5 + $0x10] sm:$0x3] }
  0xe4   : > { %v395_v24 = vmul.f32 %v2851_v14, %v381_v21  ;;  %v373_v25 = vmul.f32 %v2854_v15, %v360_v23  ;;  %v374_v26 = vmul.f32 %v2857_v16, %v359_v22  ;;  %v396_v27 = vmul.f32 %v2860_v17, %v380_v20 }
  0xe5   : > { %v2950_v12 = vrot.slane %v2187_v0, %v2838_v8  ;;  %v2953_v13 = vrot.slane %v2187_v0, %v2840_v9 }
  0xe6   : > { %v400_v30 = vpop.permute.xlu1 %399  ;;  %v398_v31 = vpop.permute.xlu0 %397  ;;  %v2196_v32 = vpack.c.bf16 %v396_v27, %v374_v26  ;;  %v2198_v33 = vpack.c.bf16 %v395_v24, %v373_v25  ;;  %v2968_v25 = vrot.slane %v2188_v18, %v2840_v9 }
  0xe7   : > { %v402_v40 = vsel %vm401_vm2, %v398_v31, %v400_v30  ;;  %v403_v41 = vsel %vm401_vm2, %v400_v30, %v398_v31  ;;  %v2975_v30 = vrot.slane %v2188_v18, %v2838_v8 }
  0xe8   : > { %2197 = vmatprep.subr.bf16.mxu1 %v2196_v32  ;;  %v417_v50 = vmul.f32 %v2886_v35, %v403_v41  ;;  %v418_v51 = vmul.f32 %v2889_v36, %v402_v40 }
  0xe9   : > { %2199 = vmatpush1.bf16.msra.mxu1 %v2198_v33 }
  0xea   : > { %v422_v42 = vpop.permute.xlu1 %421  ;;  %v420_v43 = vpop.permute.xlu0 %419 }
  0xeb   : > { %v424_v46 = vsel %vm423_vm3, %v420_v43, %v422_v42  ;;  %v425_v47 = vsel %vm423_vm3, %v422_v42, %v420_v43  ;;  %v350_v42 = vld [vmem:[#allocation5] sm:$0xff] }
  0xec   : > { %v439_v52 = vmul.f32 %v2892_v37, %v425_v47  ;;  %v440_v53 = vmul.f32 %v2895_v38, %v424_v46 }
  0xee   : > { %v459_v54 = vpop.permute.xlu1 %458  ;;  %v457_v55 = vpop.permute.xlu0 %456  ;;  %v2200_v56 = vpack.c.bf16 %v440_v53, %v418_v51  ;;  %v2202_v57 = vpack.c.bf16 %v439_v52, %v417_v50  ;;  %v628_v53 = vld [vmem:[%s3162_s4] sm:$0xff] }
  0xef   : > { %v461_v60 = vsel %vm460_vm4, %v457_v55, %v459_v54  ;;  %v462_v61 = vsel %vm460_vm4, %v459_v54, %v457_v55  ;;  %v629_v54 = vld [vmem:[%s3162_s4 + $0x8] sm:$0xff] }
  0xf0   : > { %v476_v62 = vmul.f32 %v2916_v48, %v461_v60  ;;  %v477_v63 = vmul.f32 %v2919_v49, %v462_v61  ;;  %2201 = vmatprep.subr.bf16.mxu1 %v2200_v56 }
  0xf1   : > { %2203 = vmatpush1.bf16.msra.mxu1 %v2202_v57 }
  0xf2   : > { %v481_v1 = vpop.permute.xlu1 %480  ;;  %v479_v4 = vpop.permute.xlu0 %478  ;;  %v2204_v5 = vpack.c.bf16 %v477_v63, %v455_v58  ;;  %v2206_v6 = vpack.c.bf16 %v476_v62, %v454_v59 }
  0xf3   : > { %v483_v19 = vsel %vm482_vm5, %v479_v4, %v481_v1  ;;  %v484_v20 = vsel %vm482_vm5, %v481_v1, %v479_v4 }
  0xf4   : > { %2205 = vmatprep.subr.bf16.mxu1 %v2204_v5  ;;  %v498_v26 = vmul.f32 %v2943_v10, %v483_v19  ;;  %v499_v27 = vmul.f32 %v2946_v11, %v484_v20 }
  0xf5   : > { %2207 = vmatpush1.bf16.msra.mxu1 %v2206_v6 }
  0xf6   : > { %v503_v21 = vpop.permute.xlu1 %502  ;;  %v501_v22 = vpop.permute.xlu0 %500 }
  0xf7   : > { %v505_v23 = vsel %vm504_vm6, %v501_v22, %v503_v21  ;;  %v506_v24 = vsel %vm504_vm6, %v503_v21, %v501_v22 }
  0xf8   : > { %v520_v28 = vmul.f32 %v2950_v12, %v505_v23  ;;  %v521_v29 = vmul.f32 %v2953_v13, %v506_v24 }
  0xfa   : > { %v525_v31 = vpop.permute.xlu1 %524  ;;  %v523_v32 = vpop.permute.xlu0 %522  ;;  %v2208_v33 = vpack.c.bf16 %v521_v29, %v499_v27  ;;  %v2210_v34 = vpack.c.bf16 %v520_v28, %v498_v26 }
  0xfb   : > { %v527_v39 = vsel %vm526_vm7, %v523_v32, %v525_v31  ;;  %v528_v9 = vsel %vm526_vm7, %v525_v31, %v523_v32 }
  0xfc   : > { %v543_v40 = vmul.f32 %v2968_v25, %v528_v9  ;;  %2209 = vmatprep.subr.bf16.mxu1 %v2208_v33  ;;  %v542_v41 = vmul.f32 %v2975_v30, %v527_v39 }
  0xfd   : > { %2211 = vmatpush1.bf16.msra.mxu1 %v2210_v34 }
  0xfe   : > { %569 = vmatprep.subr.mxu1 %v543_v40 }
 0x101   : > { %570 = vmatpush1.msra.mxu1 %v542_v41 }
 0x102   : > { %2189 = vmatmul.mubr.msk.f32.vlgmr.msra.gmra.mrb[0].mxu1 %vm549_vm8, %v350_v42 }
 0x103   : > { %776 = vmatprep.mubr.f32.mxu1 %v2572_v2 }
 0x10b   : > { %v547_v8 = vpop.permute.xlu0 %546 }
 0x1d5   : > { %v619_v43 = vpop.f32.mrb[0].mxu1 }
 0x1d6   : > { %v620_v46 = vadd.f32 %v619_v43, %v547_v8  ;;  %v621_v47 = vpop.f32.mrb[1].mxu1 }
 0x1d7   : > { %v622_v51 = vadd.f32 %v621_v47, %v547_v8 }
 0x1d8   : > { %v624_v50 = vmax.f32 %v620_v46, 0.0 }
 0x1d9   : > { %v625_v52 = vmax.f32 %v622_v51, 0.0 }
 0x1da   : > { %638 = vrot.lane.b32.xlu0 %v624_v50, %s2566_s13  ;;  %630 = vrot.lane.b32.xlu1 %v624_v50, %s2567_s25  ;;  %v662_v34 = vmul.f32 %v624_v50, %v2909_v45 }
 0x1de   : > { %646 = vrot.lane.b32.xlu0 %v624_v50, %s2568_s11  ;;  %632 = vrot.lane.b32.xlu1 %v625_v52, %s2567_s25 }
 0x1e2   : > { %654 = vrot.lane.b32.xlu0 %v624_v50, %s2569_s10  ;;  %640 = vrot.lane.b32.xlu1 %v625_v52, %s2566_s13 }
 0x1e6   : > { %664 = vrot.lane.b32.xlu0 %v624_v50, %s2570_s14  ;;  %648 = vrot.lane.b32.xlu1 %v625_v52, %s2568_s11 }
 0x1ea   : > { %672 = vrot.lane.b32.xlu0 %v624_v50, %s3185_s15  ;;  %656 = vrot.lane.b32.xlu1 %v625_v52, %s2569_s10  ;;  %s2072_s10 = scalar_lea.sflag [#allocation4], %s2784_s20 }
 0x1ee   : > { %680 = vrot.lane.b32.xlu0 %v624_v50, %s3186_s24  ;;  %666 = vrot.lane.b32.xlu1 %v625_v52, %s2570_s14  ;;  %s2576_s14 = smov [#allocation8]  }
 0x1f2   : > { %688 = vrot.lane.b32.xlu0 %v624_v50, %s2575_s23  ;;  %674 = vrot.lane.b32.xlu1 %v625_v52, %s3185_s15  ;;  %s2192_s15 = sshll.u32 %s2643_s9, 4 }
 0x1f3   : > { %s3114_s11 = scalar_lea.hbm %s3166_s8, %s2192_s15 }
 0x1f6   : > { %698 = vperm.xlu0 %2401, %v628_v53   ;;  %682 = vrot.lane.b32.xlu1 %v625_v52, %s3186_s24  ;;  %s347_s24 = scalar_lea.vmem [#allocation8], %s2784_s20 }
 0x1f7   : > { %s2084_s25 = sshll.u32 %s347_s24, 4  ;;  %s3116_s25 = int_to_ptr.vmem [resolvable:$true] %s2084_s25 }
 0x1f8   : > { %s2489_s9 = scalar_lea.vmem %s3116_s25, 16 }
 0x1f9   : > { %p2490_p2 = scmp.ne.s32.totalorder %s3116_s25, %s2489_s9 }
 0x1fa   : > { %690 = vrot.lane.b32.xlu1 %v625_v52, %s2575_s23  ;;  %s2493_s23 = sshll.u32 %s2576_s14, 4  ;;  %s2494_s23 = int_to_ptr.vmem [resolvable:$false] %s2493_s23 }
 0x1fb   : > { %p2491_p1 = pnand %p2490_p2, %p2735_p4  ;;  %s2495_s18 = scalar_lea.vmem %s2494_s23, 32 }
 0x1fc   : > { %p2496_p8 = scmp.lt.s32.totalorder %s3116_s25, %s2494_s23  ;;  %p2497_p12 = scmp.lt.s32.totalorder %s2495_s18, %s2489_s9 }
 0x1fd   : > { %p2492_p6 = pneg %p2491_p1 }
 0x1fe   : > { %703 = vperm.xlu1 %2402, %v629_v54   ;;  %v795_v54 = vld [vmem:[#allocation7 + $0x8] sm:$0xff]  ;;  %p2498_p3 = por %p2497_p12, %p2496_p8 }
 0x200   : > { %p2499_p7 = pnand %p2498_p3, %p2492_p6 }
 0x24c   : > { %v639_v55 = vpop.permute.xlu0 %638  ;;  %v631_v56 = vpop.permute.xlu1 %630 }
 0x250   : > { %v647_v57 = vpop.permute.xlu0 %646  ;;  %v633_v58 = vpop.permute.xlu1 %632 }
 0x251   : > { %v634_v59 = vsel %vm358_vm1, %v631_v56, %v633_v58  ;;  %v635_v60 = vsel %vm358_vm1, %v633_v58, %v631_v56 }
 0x252   : > { %v636_v0 = vmul.f32 %v635_v60, %v2854_v15  ;;  %v637_v1 = vmul.f32 %v634_v59, %v2857_v16  ;;  %v1275_v59 = vld [vmem:[#allocation7 + $0xd8] sm:$0xff] }
 0x254   : > { %v655_v61 = vpop.permute.xlu0 %654  ;;  %v641_v62 = vpop.permute.xlu1 %640 }
 0x255   : > { %v642_v63 = vsel %vm379_vm0, %v639_v55, %v641_v62  ;;  %v643_v3 = vsel %vm379_vm0, %v641_v62, %v639_v55  ;;  %v797_v55 = vld [vmem:[#allocation7 + $0x18] sm:$0xff]  ;;  %v1274_v62 = vld [vmem:[#allocation7 + $0xd0] sm:$0xff] }
 0x256   : > { %v644_v4 = vmul.f32 %v643_v3, %v2851_v14  ;;  %v645_v5 = vmul.f32 %v642_v63, %v2860_v17  ;;  %v871_v3 = vld [vmem:[#allocation7 + $0x28] sm:$0xff] }
 0x258   : > { %v2214_v6 = vpack.c.bf16 %v644_v4, %v636_v0  ;;  %v649_v18 = vpop.permute.xlu1 %648  ;;  %v2212_v19 = vpack.c.bf16 %v645_v5, %v637_v1  ;;  %v665_v20 = vpop.permute.xlu0 %664  ;;  %v1353_v1 = vld [vmem:[#allocation7 + $0xe8] sm:$0xff]  ;;  %v1355_v4 = vld [vmem:[#allocation7 + $0xf8] sm:$0xff] }
 0x259   : > { %v650_v21 = vsel %vm401_vm2, %v647_v57, %v649_v18  ;;  %v651_v22 = vsel %vm401_vm2, %v649_v18, %v647_v57  ;;  %v796_v57 = vld [vmem:[#allocation7 + $0x10] sm:$0xff]  ;;  %v2256_v5 = vpack.c.bf16 %v1355_v4, %v1353_v1  ;;  %v1193_v4 = vld [vmem:[#allocation7 + $0xa8] sm:$0xff] }
 0x25a   : > { %2213 = vmatprep.subr.bf16.mxu1 %v2212_v19  ;;  %v652_v16 = vmul.f32 %v651_v22, %v2886_v35  ;;  %v653_v17 = vmul.f32 %v650_v21, %v2889_v36  ;;  %v870_v21 = vld [vmem:[#allocation7 + $0x20] sm:$0xff]  ;;  %v872_v22 = vld [vmem:[#allocation7 + $0x30] sm:$0xff] }
 0x25b   : > { %2215 = vmatpush1.bf16.msra.mxu1 %v2214_v6  ;;  %v1114_v1 = vld [vmem:[#allocation7 + $0x90] sm:$0xff] }
 0x25c   : > { %v657_v23 = vpop.permute.xlu1 %656  ;;  %v673_v27 = vpop.permute.xlu0 %672 }
 0x25d   : > { %v658_v15 = vsel %vm423_vm3, %v655_v61, %v657_v23  ;;  %v659_v14 = vsel %vm423_vm3, %v657_v23, %v655_v61  ;;  %v1272_v61 = vld [vmem:[#allocation7 + $0xc0] sm:$0xff] }
 0x25e   : > { %v660_v24 = vmul.f32 %v659_v14, %v2892_v37  ;;  %v661_v26 = vmul.f32 %v658_v15, %v2895_v38  ;;  %v663_v37 = vmul.f32 %v625_v52, %v2906_v44  ;;  %v2254_v63 = vpack.c.bf16 %v1274_v62, %v1272_v61  ;;  %v953_v15 = vld [vmem:[#allocation7 + $0x48] sm:$0xff]  ;;  %v955_v14 = vld [vmem:[#allocation7 + $0x58] sm:$0xff] }
 0x260   : > { %v2218_v28 = vpack.c.bf16 %v660_v24, %v652_v16  ;;  %v667_v29 = vpop.permute.xlu1 %666  ;;  %v2216_v31 = vpack.c.bf16 %v661_v26, %v653_v17  ;;  %v681_v40 = vpop.permute.xlu0 %680  ;;  %v2234_v24 = vpack.c.bf16 %v872_v22, %v870_v21  ;;  %v1352_v26 = vld [vmem:[#allocation7 + $0xe0] sm:$0xff]  ;;  %v1671_v22 = vld [vmem:[#allocation7 + $0x168] sm:$0xff] }
 0x261   : > { %v668_v32 = vsel %vm460_vm4, %v665_v20, %v667_v29  ;;  %v669_v33 = vsel %vm460_vm4, %v667_v29, %v665_v20  ;;  %v2236_v29 = vpack.c.bf16 %v955_v14, %v953_v15 }
 0x262   : > { %v670_v35 = vmul.f32 %v668_v32, %v2916_v48  ;;  %v671_v36 = vmul.f32 %v669_v33, %v2919_v49  ;;  %2217 = vmatprep.subr.bf16.mxu1 %v2216_v31  ;;  %v1433_v31 = vld [vmem:[#allocation7 + $0x108] sm:$0xff]  ;;  %v1435_v32 = vld [vmem:[#allocation7 + $0x118] sm:$0xff] }
 0x263   : > { %2219 = vmatpush1.bf16.msra.mxu1 %v2218_v28 }
 0x264   : > { %v2222_v38 = vpack.c.bf16 %v670_v35, %v662_v34  ;;  %v675_v39 = vpop.permute.xlu1 %674  ;;  %v2220_v9 = vpack.c.bf16 %v671_v36, %v663_v37  ;;  %v689_v47 = vpop.permute.xlu0 %688 }
 0x265   : > { %v676_v41 = vsel %vm482_vm5, %v673_v27, %v675_v39  ;;  %v677_v42 = vsel %vm482_vm5, %v675_v39, %v673_v27  ;;  %v1354_v27 = vld [vmem:[#allocation7 + $0xf0] sm:$0xff] }
 0x266   : > { %2221 = vmatprep.subr.bf16.mxu1 %v2220_v9  ;;  %v678_v49 = vmul.f32 %v676_v41, %v2943_v10  ;;  %v679_v8 = vmul.f32 %v677_v42, %v2946_v11  ;;  %v2228_v11 = vpack.c.bf16 %v797_v55, %v795_v54  ;;  %v2258_v36 = vpack.c.bf16 %v1354_v27, %v1352_v26  ;;  %v954_v41 = vld [vmem:[#allocation7 + $0x50] sm:$0xff]  ;;  %v1033_v42 = vld [vmem:[#allocation7 + $0x68] sm:$0xff] }
 0x267   : > { %2223 = vmatpush1.bf16.msra.mxu1 %v2222_v38  ;;  %v2260_v38 = vpack.c.bf16 %v1435_v32, %v1433_v31  ;;  %v1670_v32 = vld [vmem:[#allocation7 + $0x160] sm:$0xff] }
 0x268   : > { %v683_v45 = vpop.permute.xlu1 %682 }
 0x269   : > { %v684_v48 = vsel %vm504_vm6, %v681_v40, %v683_v45  ;;  %v685_v44 = vsel %vm504_vm6, %v683_v45, %v681_v40  ;;  %v952_v40 = vld [vmem:[#allocation7 + $0x40] sm:$0xff]  ;;  %v1035_v45 = vld [vmem:[#allocation7 + $0x78] sm:$0xff] }
 0x26a   : > { %v686_v43 = vmul.f32 %v684_v48, %v2950_v12  ;;  %v687_v46 = vmul.f32 %v685_v44, %v2953_v13  ;;  %v626_v13 = vld [vmem:[%s3161_s3] sm:$0xff]  ;;  %v2238_v44 = vpack.c.bf16 %v954_v41, %v952_v40  ;;  %v1750_v41 = vld [vmem:[#allocation7 + $0x180] sm:$0xff] }
 0x26c   : > { %v2226_v50 = vpack.c.bf16 %v686_v43, %v678_v49  ;;  %v691_v51 = vpop.permute.xlu1 %690  ;;  %v2224_v52 = vpack.c.bf16 %v687_v46, %v679_v8  ;;  %v1432_v49 = vld [vmem:[#allocation7 + $0x100] sm:$0xff]  ;;  %v1434_v8 = vld [vmem:[#allocation7 + $0x110] sm:$0xff]  ;;  %v2240_v46 = vpack.c.bf16 %v1035_v45, %v1033_v42 }
 0x26d   : > { %v693_v53 = vsel %vm526_vm7, %v691_v51, %v689_v47  ;;  %v692_v56 = vsel %vm526_vm7, %v689_v47, %v691_v51  ;;  %v1509_v47 = vld [vmem:[#allocation7 + $0x128] sm:$0xff]  ;;  %v1752_v42 = vld [vmem:[#allocation7 + $0x190] sm:$0xff] }
 0x26e   : > { %v695_v10 = vmul.f32 %v693_v53, %v2968_v25  ;;  %2225 = vmatprep.subr.bf16.mxu1 %v2224_v52  ;;  %v694_v12 = vmul.f32 %v692_v56, %v2975_v30  ;;  %v794_v25 = vld [vmem:[#allocation7] sm:$0xff]  ;;  %v1273_v30 = vld [vmem:[#allocation7 + $0xc8] sm:$0xff]  ;;  %v2262_v52 = vpack.c.bf16 %v1434_v8, %v1432_v49 }
 0x26f   : > { %2227 = vmatpush1.bf16.msra.mxu1 %v2226_v50  ;;  %v2230_v58 = vpack.c.bf16 %v796_v57, %v794_v25  ;;  %v2252_v60 = vpack.c.bf16 %v1275_v59, %v1273_v30  ;;  %v1511_v50 = vld [vmem:[#allocation7 + $0x138] sm:$0xff]  ;;  %v1032_v56 = vld [vmem:[#allocation7 + $0x60] sm:$0xff]  ;;  %v1510_v57 = vld [vmem:[#allocation7 + $0x130] sm:$0xff] }
 0x270   : > { %728 = vmatprep.subr.mxu1 %v695_v10  ;;  %v2264_v55 = vpack.c.bf16 %v1511_v50, %v1509_v47  ;;  %v1034_v10 = vld [vmem:[#allocation7 + $0x70] sm:$0xff]  ;;  %v1508_v25 = vld [vmem:[#allocation7 + $0x120] sm:$0xff]  ;;  %v1591_v59 = vld [vmem:[#allocation7 + $0x148] sm:$0xff] }
 0x271   : > { %2253 = vmatprep.subr.bf16.mxu0 %v2252_v60  ;;  %v1593_v60 = vld [vmem:[#allocation7 + $0x158] sm:$0xff]  ;;  %v2266_v62 = vpack.c.bf16 %v1510_v57, %v1508_v25  ;;  %v1832_v47 = vld [vmem:[#allocation7 + $0x1b0] sm:$0xff]  ;;  %v1911_v50 = vld [vmem:[#allocation7 + $0x1c8] sm:$0xff] }
 0x272   : > { %2255 = vmatpush1.bf16.xpose.msra.mxu0 %v2254_v63 }
 0x273   : > { %729 = vmatpush1.msra.mxu1 %v694_v12  ;;  %2257 = vmatprep.subr.bf16.mxu0 %v2256_v5  ;;  %v1115_v12 = vld [vmem:[#allocation7 + $0x98] sm:$0xff] }
 0x274   : > { %2190 = vmatmul.mubr.msk.f32.vlgmr.msra.gmra.mrb[2].mxu1 %vm549_vm8, %v626_v13  ;;  %2229 = vmatprep.subr.bf16.mxu1 %v2228_v11  ;;  %v1113_v11 = vld [vmem:[#allocation7 + $0x88] sm:$0xff]  ;;  %v1195_v5 = vld [vmem:[#allocation7 + $0xb8] sm:$0xff] }
 0x275   : > { %782 = vmatprep.mubr.f32.mxu1 %v2572_v2  ;;  %v873_v2 = vld [vmem:[#allocation7 + $0x38] sm:$0xff]  ;;  %v699_v6 = vpop.permute.xlu0 %698  ;;  %v2244_v30 = vpack.c.bf16 %v1115_v12, %v1113_v11  ;;  %v2248_v21 = vpack.c.bf16 %v1195_v5, %v1193_v4  ;;  %v1991_v11 = vld [vmem:[#allocation7 + $0x1e8] sm:$0xff] }
 0x276   : > { %v2232_v0 = vpack.c.bf16 %v873_v2, %v871_v3  ;;  %v2268_v2 = vpack.c.bf16 %v1593_v60, %v1591_v59  ;;  %v1993_v12 = vld [vmem:[#allocation7 + $0x1f8] sm:$0xff] }
 0x277   : > { %v2288_v25 = vpack.c.bf16 %v1993_v12, %v1991_v11 }
 0x278   : > { %2191 = vmatmul.mubr.msk.f32.gmra.mrb[4].mxu1 %vm549_vm8, %v627_v7  ;;  %v2242_v7 = vpack.c.bf16 %v1034_v10, %v1032_v56  ;;  %v1910_v56 = vld [vmem:[#allocation7 + $0x1c0] sm:$0xff]  ;;  %v1912_v10 = vld [vmem:[#allocation7 + $0x1d0] sm:$0xff] }
 0x27a   : > { %2231 = vmatpush1.bf16.xpose.msra.mxu1 %v2230_v58 }
 0x27b   : > { %2233 = vmatprep.subr.bf16.mxu1 %v2232_v0  ;;  %v1112_v0 = vld [vmem:[#allocation7 + $0x80] sm:$0xff] }
 0x27d   : > { %v704_v39 = vpop.permute.xlu1 %703 }
 0x347   : > { %v778_v18 = vpop.f32.mrb[2].mxu1 }
 0x348   : > { %v779_v19 = vadd.f32 %v778_v18, %v699_v6  ;;  %v780_v20 = vpop.f32.mrb[3].mxu1  ;;  %v1590_v18 = vld [vmem:[#allocation7 + $0x140] sm:$0xff] }
 0x349   : > { %v781_v23 = vadd.f32 %v780_v20, %v699_v6  ;;  %v2246_v6 = vpack.c.bf16 %v1114_v1, %v1112_v0  ;;  %v793_v0 = vld [vmem:[%s3165_s7] sm:$0x1] }
 0x34a   : > { %v3066_v16 = vmax.f32 %v779_v19, 0.0  ;;  %v1592_v19 = vld [vmem:[#allocation7 + $0x150] sm:$0xff] }
 0x34b   : > { %v3068_v17 = vmax.f32 %v781_v23, 0.0  ;;  %v784_v28 = vpop.f32.mrb[4].mxu1  ;;  %v1673_v23 = vld [vmem:[#allocation7 + $0x178] sm:$0xff]  ;;  %v2270_v14 = vpack.c.bf16 %v1592_v19, %v1590_v18 }
 0x34c   : > { %v786_v33 = vpop.f32.mrb[5].mxu1  ;;  %v1276_v37 = vrot.slane %v3066_v16, 6  ;;  %v876_v43 = vrot.slane %v3066_v16, 1  ;;  %v1356_v54 = vrot.slane %v3066_v16, 7  ;;  %v785_v13 = vadd.f32 %v784_v28, %v704_v39  ;;  %v1192_v28 = vld [vmem:[#allocation7 + $0xa0] sm:$0xff] }
 0x34d   : > { %862 = vmatprep.mubr.f32.mxu1 %v3068_v17  ;;  %v877_v34 = vrot.slane %v3068_v17, 1  ;;  %v1277_v35 = vrot.slane %v3068_v17, 6  ;;  %v1357_v9 = vrot.slane %v3068_v17, 7  ;;  %v787_v48 = vadd.f32 %v786_v33, %v704_v39  ;;  %v1672_v33 = vld [vmem:[#allocation7 + $0x170] sm:$0xff] }
 0x34e   : > { %863 = vmatmul.mubr.f32.vlgmr.msra.gmra.mrb[6].mxu1 %v3066_v16  ;;  %v957_v51 = vrot.slane %v3068_v17, 2  ;;  %v956_v58 = vrot.slane %v3066_v16, 2  ;;  %v1037_v61 = vrot.slane %v3068_v17, 3  ;;  %v3085_v3 = vmax.f32 %v785_v13, 0.0 }
 0x34f   : > { %2235 = vmatpush1.bf16.xpose.msra.mxu1 %v2234_v24  ;;  %944 = vmatprep.mubr.f32.mxu1 %v877_v34  ;;  %v3078_v53 = vmax.f32 %v787_v48, 0.0  ;;  %v1036_v20 = vrot.slane %v3066_v16, 3  ;;  %v1117_v15 = vrot.slane %v3068_v17, 4  ;;  %v2272_v26 = vpack.c.bf16 %v1673_v23, %v1671_v22  ;;  %v1831_v48 = vld [vmem:[#allocation7 + $0x1a8] sm:$0xff] }
 0x350   : > { %1344 = vmatprep.mubr.f32.mxu0 %v1277_v35  ;;  %2237 = vmatprep.subr.bf16.mxu1 %v2236_v29  ;;  %v1514_v24 = vrot.slane %v3085_v3, 1  ;;  %v1194_v29 = vld [vmem:[#allocation7 + $0xb0] sm:$0xff]  ;;  %v1116_v34 = vrot.slane %v3066_v16, 4  ;;  %v1751_v35 = vld [vmem:[#allocation7 + $0x188] sm:$0xff]  ;;  %v1594_v39 = vrot.slane %v3085_v3, 2  ;;  %v1196_v45 = vrot.slane %v3066_v16, 5 }
 0x351   : > { %1345 = vmatmul.mubr.f32.vlgmr.msra.gmra.mrb[0].mxu0 %v1276_v37  ;;  %v1515_v63 = vrot.slane %v3078_v53, 1  ;;  %v1595_v27 = vrot.slane %v3078_v53, 2  ;;  %v2250_v31 = vpack.c.bf16 %v1194_v29, %v1192_v28  ;;  %v1197_v37 = vrot.slane %v3068_v17, 5 }
 0x352   : > { %2259 = vmatpush1.bf16.xpose.msra.mxu0 %v2258_v36  ;;  %1424 = vmatprep.mubr.f32.mxu0 %v1357_v9  ;;  %v1753_v36 = vld [vmem:[#allocation7 + $0x198] sm:$0xff]  ;;  %v1675_v40 = vrot.slane %v3078_v53, 3  ;;  %v2278_v17 = vpack.c.bf16 %v1752_v42, %v1750_v41  ;;  %v1674_v49 = vrot.slane %v3085_v3, 3  ;;  %v1754_v16 = vrot.slane %v3085_v3, 4 }
 0x353   : > { %2261 = vmatprep.subr.bf16.mxu0 %v2260_v38  ;;  %v2274_v38 = vpack.c.bf16 %v1672_v33, %v1670_v32  ;;  %v2276_v9 = vpack.c.bf16 %v1753_v36, %v1751_v35  ;;  %v2286_v13 = vpack.c.bf16 %v1912_v10, %v1910_v56  ;;  %v1915_v57 = vrot.slane %v3078_v53, 6 }
 0x354   : > { %v1914_v60 = vrot.slane %v3085_v3, 6 }
 0x356   : > { %945 = vmatmul.mubr.f32.vlgmr.msra.gmra.mrb[6].mxu1 %v876_v43  ;;  %v1755_v43 = vrot.slane %v3078_v53, 4 }
 0x357   : > { %2239 = vmatpush1.bf16.xpose.msra.mxu1 %v2238_v44  ;;  %1024 = vmatprep.mubr.f32.mxu1 %v957_v51  ;;  %v1833_v44 = vld [vmem:[#allocation7 + $0x1b8] sm:$0xff] }
 0x358   : > { %2241 = vmatprep.subr.bf16.mxu1 %v2240_v46  ;;  %v2280_v8 = vpack.c.bf16 %v1833_v44, %v1831_v48  ;;  %v1830_v46 = vld [vmem:[#allocation7 + $0x1a0] sm:$0xff]  ;;  %v1913_v51 = vld [vmem:[#allocation7 + $0x1d8] sm:$0xff] }
 0x359   : > { %1425 = vmatmul.mubr.f32.vlgmr.msra.gmra.mrb[0].mxu0 %v1356_v54  ;;  %v2284_v54 = vpack.c.bf16 %v1913_v51, %v1911_v50 }
 0x35a   : > { %2263 = vmatpush1.bf16.xpose.msra.mxu0 %v2262_v52  ;;  %1500 = vmatprep.mubr.f32.mxu0 %v3078_v53  ;;  %v2282_v52 = vpack.c.bf16 %v1832_v47, %v1830_v46 }
 0x35b   : > { %2265 = vmatprep.subr.bf16.mxu0 %v2264_v55  ;;  %v1835_v55 = vrot.slane %v3078_v53, 5 }
 0x35e   : > { %1025 = vmatmul.mubr.f32.vlgmr.msra.gmra.mrb[6].mxu1 %v956_v58  ;;  %v1990_v58 = vld [vmem:[#allocation7 + $0x1e0] sm:$0xff] }
 0x35f   : > { %2243 = vmatpush1.bf16.xpose.msra.mxu1 %v2242_v7  ;;  %1104 = vmatprep.mubr.f32.mxu1 %v1037_v61  ;;  %v1834_v7 = vrot.slane %v3085_v3, 5  ;;  %v1995_v61 = vrot.slane %v3078_v53, 7 }
 0x360   : > { %2245 = vmatprep.subr.bf16.mxu1 %v2244_v30  ;;  %v1992_v30 = vld [vmem:[#allocation7 + $0x1f0] sm:$0xff] }
 0x361   : > { %1501 = vmatmul.mubr.f32.vlgmr.msra.gmra.mrb[0].mxu0 %v3085_v3  ;;  %v2290_v59 = vpack.c.bf16 %v1992_v30, %v1990_v58 }
 0x362   : > { %2267 = vmatpush1.bf16.xpose.msra.mxu0 %v2266_v62  ;;  %1582 = vmatprep.mubr.f32.mxu0 %v1515_v63  ;;  %v1994_v62 = vrot.slane %v3085_v3, 7 }
 0x363   : > { %2269 = vmatprep.subr.bf16.mxu0 %v2268_v2 }
 0x366   : > { %1105 = vmatmul.mubr.f32.vlgmr.msra.gmra.mrb[6].mxu1 %v1036_v20 }
 0x367   : > { %2247 = vmatpush1.bf16.xpose.msra.mxu1 %v2246_v6  ;;  %1184 = vmatprep.mubr.f32.mxu1 %v1117_v15 }
 0x368   : > { %2249 = vmatprep.subr.bf16.mxu1 %v2248_v21 }
 0x369   : > { %1583 = vmatmul.mubr.f32.vlgmr.msra.gmra.mrb[0].mxu0 %v1514_v24 }
 0x36a   : > { %2271 = vmatpush1.bf16.xpose.msra.mxu0 %v2270_v14  ;;  %1662 = vmatprep.mubr.f32.mxu0 %v1595_v27 }
 0x36b   : > { %2273 = vmatprep.subr.bf16.mxu0 %v2272_v26 }
 0x36e   : > { %1185 = vmatmul.mubr.f32.vlgmr.msra.gmra.mrb[6].mxu1 %v1116_v34 }
 0x36f   : > { %2251 = vmatpush1.bf16.xpose.msra.mxu1 %v2250_v31  ;;  %1264 = vmatprep.mubr.f32.mxu1 %v1197_v37 }
 0x371   : > { %1663 = vmatmul.mubr.f32.vlgmr.msra.gmra.mrb[0].mxu0 %v1594_v39 }
 0x372   : > { %2275 = vmatpush1.bf16.xpose.msra.mxu0 %v2274_v38  ;;  %1742 = vmatprep.mubr.f32.mxu0 %v1675_v40 }
 0x373   : > { %2277 = vmatprep.subr.bf16.mxu0 %v2276_v9 }
 0x376   : > { %1265 = vmatmul.mubr.f32.vlgmr.msra.gmra.mrb[6].mxu1 %v1196_v45 }
 0x379   : > { %1743 = vmatmul.mubr.f32.vlgmr.msra.gmra.mrb[0].mxu0 %v1674_v49 }
 0x37a   : > { %2279 = vmatpush1.bf16.xpose.msra.mxu0 %v2278_v17  ;;  %1822 = vmatprep.mubr.f32.mxu0 %v1755_v43 }
 0x37b   : > { %2281 = vmatprep.subr.bf16.mxu0 %v2280_v8 }
 0x381   : > { %1823 = vmatmul.mubr.f32.vlgmr.msra.gmra.mrb[0].mxu0 %v1754_v16 }
 0x382   : > { %2283 = vmatpush1.bf16.xpose.msra.mxu0 %v2282_v52  ;;  %1902 = vmatprep.mubr.f32.mxu0 %v1835_v55 }
 0x383   : > { %2285 = vmatprep.subr.bf16.mxu0 %v2284_v54 }
 0x389   : > { %1903 = vmatmul.mubr.f32.vlgmr.msra.gmra.mrb[0].mxu0 %v1834_v7 }
 0x38a   : > { %2287 = vmatpush1.bf16.xpose.msra.mxu0 %v2286_v13  ;;  %1982 = vmatprep.mubr.f32.mxu0 %v1915_v57 }
 0x38b   : > { %2289 = vmatprep.subr.bf16.mxu0 %v2288_v25 }
 0x391   : > { %1983 = vmatmul.mubr.f32.vlgmr.msra.gmra.mrb[0].mxu0 %v1914_v60 }
 0x392   : > { %2291 = vmatpush1.bf16.xpose.msra.mxu0 %v2290_v59  ;;  %2062 = vmatprep.mubr.f32.mxu0 %v1995_v61 }
 0x399   : > { %2063 = vmatmul.mubr.f32.vlgmr.msra.gmra.mrb[0].mxu0 %v1994_v62 }
 0x449   : > { %v1266_v63 = vpop.f32.mrb[6].mxu1 }
 0x44a   : > { %v1268_v2 = vpop.f32.mrb[7].mxu1  ;;  %v2292_v1 = vadd.f32 %v1266_v63, %v793_v0 }
 0x46c   : > { %v2064_v4 = vpop.f32.mrb[0].mxu0 }
 0x46d   : > { %v2293_v53 = vadd.f32 %v2292_v1, %v2064_v4  ;;  %v2066_v5 = vpop.f32.mrb[1].mxu0 }
 0x46f   : > { %2070 = vst.msk [vmem:[%s347_s24] sm:$0x1] %vm2069_vm9, %v2293_v53 }
 0x470   : > { %2502 = shalt.err (!%p2499_p7)
}
 0x471   : > { %s2503_s20 = scalar_lea.hbm %s3114_s11, 16  ;;  %s2507_s15 = scalar_lea.hbm %s3166_s8, 32 }
 0x472   : > { %p2504_p10 = scmp.ne.s32.totalorder %s3114_s11, %s2503_s20  ;;  %p2508_p0 = scmp.lt.u32.totalorder %s3114_s11, %s3166_s8 }
 0x473   : > { %p2509_p9 = scmp.lt.u32.totalorder %s2507_s15, %s2503_s20  ;;  %p2511_p2 = scmp.lt.u32.totalorder %s2503_s20, %s3114_s11 }
 0x474   : > { %p2505_p13 = pnand %p2504_p10, %p2735_p4 }
 0x475   : > { %p2510_p11 = por %p2509_p9, %p2508_p0 }
 0x476   : > { %p2506_p5 = pneg %p2505_p13 }
 0x477   : > { %p2512_p1 = por %p2511_p2, %p2510_p11 }
 0x479   : > { %p2513_p6 = pnand %p2512_p1, %p2506_p5 }
 0x47b   : > { %2516 = shalt.err (!%p2513_p6)
}
 0x47c   : > { %2332 = dma.vmem_to_hbm [thread:$0]  (%p2735_p4), %s3116_s25, 16, %s3114_s11, %s2072_s10  }
 0x47d PF: > { %s2096_s13 = sand.u32 1, %s2547_s27   ;;  %p3187_p8 = scmp.ne.s32.totalorder %s3175_s12, 0 }
 0x47e   : > { %p3188_p12 = scmp.ge.s32.totalorder %s2559_s30, 2  ;;  %s2097_s9 = scalar_lea.sflag [#allocation4], %s2096_s13 }
 0x480   : > { %p2346_p3 = pnand %p3188_p12, %p3187_p8 }
 0x482   : > { %2542 = dma.done.wait (!%p2346_p3), %s2097_s9, 16  }
 0x483   : > { %2544 = vsyncadd (!%p2346_p3), %s2097_s9, 4294967280  ;;  %p22_p7 = scmp.ge.s32.totalorder %s2725_s16, 4   ;;  %s3189_s27 = smov %s2551_s28 }
 0x484   : > { %s3190_s28 = smov %s2555_s29  ;;  %s3191_s29 = smov %s2741_s22 }
 0x485   : > { %s3192_s30 = smov %s2725_s16  ;;  %24 = sbr.rel (!%p22_p7) target bundleno = 6 (0x6), region = 128 }
 0x48c   :  { %2101 = vsyncpa [#allocation3], 1 }
 0x48d   :  { %2103 = vsyncpa [#allocation3 + $0x1], 1 }
 0x48e   :  { %2104 = vsyncpa [#allocation6], 1 }
 0x48f   :  { %2105 = vsyncpa [#allocation4], 1 }
 0x490   :  { %2107 = vsyncpa [#allocation4 + $0x1], 1 }

</bundles_post_ra>
